<compile_context>
chip_gen: v7x
topology: tpu7x:2x2x1
jax: 0.10.0
libtpu: 0.0.40
codegen_flags: <defaults>
</compile_context>

<pallas_src>
import jax
import jax.numpy as jnp
from jax.experimental import pallas as pl
from jax.experimental.pallas import tpu as pltpu


MAX_TB = 1024   # largest batch tile (review: 512-1024; ~11 MiB working set at 1024)
MIN_TB = 128    # smallest tile: fills MXU M rows, multiple of f32 sublane packing


def heuristic_kernel(
    x_ref,                         # (TB, D_in)   f32
    w1_ref, b1_ref,                # (D_in, 256) bf16, (1, 256) f32    fc1
    w2i1_ref, b2_ref,              # (256, 256)  bf16, (1, 128) f32    [fc2 | identity1]
    wvo3_ref, bvo3_ref, bvo_ref,   # (128, 256)  bf16, (1, 128) f32 x2 [attn->fc3 | attn]
    w4i2_ref, b4_ref,              # (128, 128)  bf16, (1, 64)  f32    [fc4 | identity2]
    w5i3_ref, b5_ref,              # (64, 32)    bf16, (1, 16)  f32    [fc5 | identity3]
    w6_ref, b6_ref,                # (1, 16) f32, (1, 1) f32           fc6 (VPU)
    out_ref,                       # (1, 1, TB)  f32  (lane-dense)
):
    f32, bf16 = jnp.float32, jnp.bfloat16
    x = x_ref[...].astype(bf16)

    # fc1 + relu (dropout1 = identity in eval mode)
    x1 = jnp.maximum(
        jnp.dot(x, w1_ref[...], preferred_element_type=f32) + b1_ref[...], 0.0)

    # fused [fc2 | identity1]: one 256-wide MXU pass; fc2 path gets bias+relu, identity1 is the
    # residual.  Split at 128 is a lane-tile boundary.
    h = jnp.dot(x1.astype(bf16), w2i1_ref[...], preferred_element_type=f32)
    x2 = jnp.maximum(h[:, :128] + b2_ref[...], 0.0) + h[:, 128:]

    # MultiheadAttention over a length-1 sequence: softmax over one key == 1 exactly, so
    #   attn = x2 @ (wv @ wo) + (bv @ wo + bo) = x2 @ wvo + bvo
    # and since there is no nonlinearity before fc3's matmul,
    #   x3 = relu(attn @ w3 + b3) + attn
    #      = relu(x2 @ (wvo @ w3) + (bvo @ w3 + b3)) + x2 @ wvo + bvo
    # -> one fused 128->256 MXU pass (wvo3 = [wvo@w3 | wvo]), all folds done in f32 offline.
    H = jnp.dot(x2.astype(bf16), wvo3_ref[...], preferred_element_type=f32)
    x3 = jnp.maximum(H[:, :128] + bvo3_ref[...], 0.0) + H[:, 128:] + bvo_ref[...]

    # fused [fc4 | identity2]  (64/64 split left unpadded: lane-padding would cost an extra MXU
    # column pass on v5e's 128-wide MXU; the in-tile split is cheap VPU/XLU work)
    h2 = jnp.dot(x3.astype(bf16), w4i2_ref[...], preferred_element_type=f32)
    x4 = jnp.maximum(h2[:, :64] + b4_ref[...], 0.0) + h2[:, 64:]

    # fused [fc5 | identity3]
    h3 = jnp.dot(x4.astype(bf16), w5i3_ref[...], preferred_element_type=f32)
    x5 = jnp.maximum(h3[:, :16] + b5_ref[...], 0.0) + h3[:, 16:]

    # fc6 (16 -> 1) on the VPU (multiply + lane reduction); an N=1 MXU pass would run at ~1/256
    # column utilization.  The per-row scalars are written as one lane-dense (1, 1, TB) row.
    col = jnp.sum(x5 * w6_ref[...], axis=-1, keepdims=True) + b6_ref[...]   # (TB, 1)
    out_ref[...] = col.reshape(out_ref.shape).astype(out_ref.dtype)


def prepare_params(p):
    """Fold/fuse raw (already-transposed, (in, out)) params into the kernel layout."""
    f32, bf16 = jnp.float32, jnp.bfloat16
    # Exact algebraic folds of the attention block and fc3, done entirely in f32 and cast to
    # bf16 once at the end (no extra intermediate rounding).
    w_vo = p["wv"].astype(f32) @ p["wo"].astype(f32)
    b_vo = p["bv"].astype(f32) @ p["wo"].astype(f32) + p["bo"]
    w_vo3 = w_vo @ p["w3"].astype(f32)
    b_vo3 = b_vo @ p["w3"].astype(f32) + p["b3"]
    return dict(
        w1=p["w1"].astype(bf16), b1=p["b1"].astype(f32),
        w2i1=jnp.concatenate([p["w2"], p["wi1"]], axis=1).astype(bf16),
        b2=p["b2"].astype(f32),
        wvo3=jnp.concatenate([w_vo3, w_vo], axis=1).astype(bf16),   # (128, 256)
        bvo3=b_vo3.astype(f32), bvo=b_vo.astype(f32),
        w4i2=jnp.concatenate([p["w4"], p["wi2"]], axis=1).astype(bf16),
        b4=p["b4"].astype(f32),
        w5i3=jnp.concatenate([p["w5"], p["wi3"]], axis=1).astype(bf16),
        b5=p["b5"].astype(f32),
        w6=p["w6"].reshape(1, 16).astype(f32), b6=p["b6"].astype(f32),
    )


def _pick_tile(B):
    """Largest tile <= MAX_TB that still leaves >= 2 tiles when B allows (v7x: 2 TensorCores)."""
    tb = MAX_TB
    while tb > MIN_TB and pl.cdiv(B, tb) < 2:
        tb //= 2
    return tb


def heuristic_model_forward(x, prepared):
    """x: (B, input_dim) float32. prepared: output of prepare_params."""
    B, D = x.shape
    TB = _pick_tile(B)
    nb = pl.cdiv(B, TB)
    b_pad = nb * TB
    if b_pad != B:
        x = jnp.pad(x, ((0, b_pad - B), (0, 0)))

    def resident(a):
        # Whole-array block with a constant index map: DMA'd once, stays resident in VMEM.
        return pl.BlockSpec(a.shape, lambda i: (0,) * a.ndim)

    weights = (
        prepared["w1"], prepared["b1"],
        prepared["w2i1"], prepared["b2"],
        prepared["wvo3"], prepared["bvo3"], prepared["bvo"],
        prepared["w4i2"], prepared["b4"],
        prepared["w5i3"], prepared["b5"],
        prepared["w6"], prepared["b6"],
    )

    # VMEM budget: double-buffered input tile + ~8 live (TB, 256) f32 intermediates + resident
    # weights (double-buffered by default).  Clamp to 32-40 MiB: above the v5e scoped default,
    # within the v7x 64 MiB physical VMEM.
    weight_bytes = sum(int(w.size) * w.dtype.itemsize for w in weights)
    est = 2 * TB * D * 4 + 8 * TB * 256 * 4 + 2 * weight_bytes + (1 << 20)
    vmem_limit = int(min(40 << 20, max(32 << 20, 2 * est)))

    out = pl.pallas_call(
        heuristic_kernel,
        out_shape=jax.ShapeDtypeStruct((nb, 1, TB), jnp.float32),
        grid=(nb,),
        in_specs=[pl.BlockSpec((TB, D), lambda i: (i, 0))]
                 + [resident(w) for w in weights],
        # Lane-dense output block: last dim TB (multiple of 128) instead of a (TB, 1) column.
        out_specs=pl.BlockSpec((1, 1, TB), lambda i: (i, 0, 0)),
        compiler_params=pltpu.CompilerParams(
            # On v7x, pltpu.CORE_PARALLEL on this axis would force cross-TensorCore sharding of
            # batch tiles; "parallel" is kept here for portability across v5e/v6e single-core.
            dimension_semantics=("parallel",),
            vmem_limit_bytes=vmem_limit,
        ),
    )(x, *weights)
    return out.reshape(b_pad, 1)[:B]


def make_params(key, input_dim):
    """Deterministic synthetic parameters matching the PyTorch module shapes.

    PyTorch nn.Linear stores weight as (out, in); we sample in that convention then transpose
    to (in, out). Kaiming-normal scale sqrt(2/fan_in); biases zero (as in _initialize_weights).
    """
    def linear(key, fan_in, fan_out, bias=True):
        w = jax.random.normal(key, (fan_out, fan_in), jnp.float32) * jnp.sqrt(2.0 / fan_in)
        wt = w.T
        if bias:
            return wt, jnp.zeros((1, fan_out), jnp.float32)
        return wt

    keys = jax.random.split(key, 12)
    p = {}
    p["w1"], p["b1"] = linear(keys[0], input_dim, 256)
    p["w2"], p["b2"] = linear(keys[1], 256, 128)
    p["w3"], p["b3"] = linear(keys[2], 128, 128)
    p["w4"], p["b4"] = linear(keys[3], 128, 64)
    p["w5"], p["b5"] = linear(keys[4], 64, 16)
    p["w6"], p["b6"] = linear(keys[5], 16, 1)
    p["wi1"] = linear(keys[6], 256, 128, bias=False)
    p["wi2"] = linear(keys[7], 128, 64, bias=False)
    p["wi3"] = linear(keys[8], 64, 16, bias=False)

    # MultiheadAttention(embed_dim=128, num_heads=4): in_proj_weight (384,128), out_proj (128,128).
    # Only the V slice and out_proj matter for seq_len == 1 (softmax over one key == 1).
    in_proj_w = jax.random.normal(keys[9], (3 * 128, 128), jnp.float32) * jnp.sqrt(2.0 / 128)
    in_proj_b = jnp.zeros((3 * 128,), jnp.float32)
    p["wv"] = in_proj_w[2 * 128:3 * 128, :].T
    p["bv"] = in_proj_b[2 * 128:3 * 128].reshape(1, 128)
    p["wo"], p["bo"] = linear(keys[10], 128, 128)
    return p


def reference_forward_f32(x, p):
    """Pure-JAX, all-f32 reference of the original PyTorch forward pass (eval mode)."""
    relu = lambda t: jnp.maximum(t, 0.0)
    x1 = relu(x @ p["w1"] + p["b1"])
    res1 = x1 @ p["wi1"]
    x2 = relu(x1 @ p["w2"] + p["b2"]) + res1
    v = x2 @ p["wv"] + p["bv"]                      # seq-len-1 attention == out_proj(v_proj(x2))
    attn = v @ p["wo"] + p["bo"]
    x3 = relu(attn @ p["w3"] + p["b3"]) + attn
    res3 = x3 @ p["wi2"]
    x4 = relu(x3 @ p["w4"] + p["b4"]) + res3
    res4 = x4 @ p["wi3"]
    x5 = relu(x4 @ p["w5"] + p["b5"]) + res4
    return x5 @ p["w6"] + p["b6"]


def reference_forward_fused(x, q):
    """Pure-JAX emulation of the exact kernel math (bf16 matmul inputs, f32 accumulation)."""
    f32, bf16 = jnp.float32, jnp.bfloat16
    relu = lambda t: jnp.maximum(t, 0.0)
    d = lambda a, w: jnp.dot(a.astype(bf16), w, preferred_element_type=f32)
    x1 = relu(d(x, q["w1"]) + q["b1"])
    h = d(x1, q["w2i1"])
    x2 = relu(h[:, :128] + q["b2"]) + h[:, 128:]
    H = d(x2, q["wvo3"])
    x3 = relu(H[:, :128] + q["bvo3"]) + H[:, 128:] + q["bvo"]
    h2 = d(x3, q["w4i2"])
    x4 = relu(h2[:, :64] + q["b4"]) + h2[:, 64:]
    h3 = d(x4, q["w5i3"])
    x5 = relu(h3[:, :16] + q["b5"]) + h3[:, 16:]
    return jnp.sum(x5 * q["w6"], axis=-1, keepdims=True) + q["b6"]


if __name__ == "__main__":
    key = jax.random.PRNGKey(0)
    k_x, k_p = jax.random.split(key)

    B, input_dim = 256, 32
    x = jax.random.normal(k_x, (B, input_dim), jnp.float32)
    raw = make_params(k_p, input_dim)
    prepared = prepare_params(raw)

    out = jax.block_until_ready(heuristic_model_forward(x, prepared))
    assert out.shape == (B, 1), out.shape

    # Tight check against a pure-JAX emulation of the exact kernel math (same bf16 dots).
    ref_fused = reference_forward_fused(x, prepared)
    assert jnp.allclose(out, ref_fused, atol=1e-2, rtol=1e-2), \
        float(jnp.max(jnp.abs(out - ref_fused)))

    # Scale-aware check against the original all-f32 module math: bf16 MXU inputs accumulate
    # ~0.2-0.4% rounding per matmul over 5 fused layers, so compare the max absolute error
    # against the output magnitude rather than a fixed absolute tolerance.
    ref_f32 = reference_forward_f32(x, raw)
    err = float(jnp.max(jnp.abs(out - ref_f32)))
    scale = float(jnp.max(jnp.abs(ref_f32)))
    assert err <= 0.08 * scale + 0.05, (err, scale)

    print("KERNEL_OK")
</pallas_src>

<mosaic_0001>
module attributes {stable_mosaic.version = 11 : i64} {
  func.func @heuristic_kernel(%arg0: i32, %arg1: memref<128x32xf32, #tpu.memory_space<vmem>>, %arg2: memref<32x256xbf16, #tpu.memory_space<vmem>>, %arg3: memref<1x256xf32, #tpu.memory_space<vmem>>, %arg4: memref<256x256xbf16, #tpu.memory_space<vmem>>, %arg5: memref<1x128xf32, #tpu.memory_space<vmem>>, %arg6: memref<128x256xbf16, #tpu.memory_space<vmem>>, %arg7: memref<1x128xf32, #tpu.memory_space<vmem>>, %arg8: memref<1x128xf32, #tpu.memory_space<vmem>>, %arg9: memref<128x128xbf16, #tpu.memory_space<vmem>>, %arg10: memref<1x64xf32, #tpu.memory_space<vmem>>, %arg11: memref<64x32xbf16, #tpu.memory_space<vmem>>, %arg12: memref<1x16xf32, #tpu.memory_space<vmem>>, %arg13: memref<1x16xf32, #tpu.memory_space<vmem>>, %arg14: memref<1x1xf32, #tpu.memory_space<vmem>>, %arg15: memref<1x1x128xf32, #tpu.memory_space<vmem>>) attributes {dimension_semantics = [#tpu.dimension_semantics<parallel>], iteration_bounds = array<i64: 2>, scalar_prefetch = 0 : i64, scratch_operands = 0 : i64, tpu.core_type = #tpu.core_type<tc>, window_params = [{transform_indices = @transform_0, window_bounds = array<i64: 128, 32>}, {pipeline_mode = #tpu.pipeline_mode<synchronous>, transform_indices = @transform_1, window_bounds = array<i64: 32, 256>}, {pipeline_mode = #tpu.pipeline_mode<synchronous>, transform_indices = @transform_2, window_bounds = array<i64: 1, 256>}, {pipeline_mode = #tpu.pipeline_mode<synchronous>, transform_indices = @transform_3, window_bounds = array<i64: 256, 256>}, {pipeline_mode = #tpu.pipeline_mode<synchronous>, transform_indices = @transform_4, window_bounds = array<i64: 1, 128>}, {pipeline_mode = #tpu.pipeline_mode<synchronous>, transform_indices = @transform_5, window_bounds = array<i64: 128, 256>}, {pipeline_mode = #tpu.pipeline_mode<synchronous>, transform_indices = @transform_6, window_bounds = array<i64: 1, 128>}, {pipeline_mode = #tpu.pipeline_mode<synchronous>, transform_indices = @transform_7, window_bounds = array<i64: 1, 128>}, {pipeline_mode = #tpu.pipeline_mode<synchronous>, transform_indices = @transform_8, window_bounds = array<i64: 128, 128>}, {pipeline_mode = #tpu.pipeline_mode<synchronous>, transform_indices = @transform_9, window_bounds = array<i64: 1, 64>}, {pipeline_mode = #tpu.pipeline_mode<synchronous>, transform_indices = @transform_10, window_bounds = array<i64: 64, 32>}, {pipeline_mode = #tpu.pipeline_mode<synchronous>, transform_indices = @transform_11, window_bounds = array<i64: 1, 16>}, {pipeline_mode = #tpu.pipeline_mode<synchronous>, transform_indices = @transform_12, window_bounds = array<i64: 1, 16>}, {pipeline_mode = #tpu.pipeline_mode<synchronous>, transform_indices = @transform_13, window_bounds = array<i64: 1, 1>}, {transform_indices = @transform_14, window_bounds = array<i64: 1, 1, 128>}]} {
    %c0 = arith.constant 0 : index
    %c0_0 = arith.constant 0 : index
    %0 = vector.load %arg1[%c0, %c0_0] : memref<128x32xf32, #tpu.memory_space<vmem>>, vector<128x32xf32>
    %1 = arith.truncf %0 : vector<128x32xf32> to vector<128x32xbf16>
    %c0_1 = arith.constant 0 : index
    %c0_2 = arith.constant 0 : index
    %2 = vector.load %arg2[%c0_1, %c0_2] : memref<32x256xbf16, #tpu.memory_space<vmem>>, vector<32x256xbf16>
    %cst = arith.constant dense<0.000000e+00> : vector<128x256xf32>
    %3 = tpu.matmul %1, %2, %cst {dimension_numbers = #tpu.dot_dimension_numbers<[1], [0], [0], [1], [0, 0, 1, 1], [], []>} : vector<128x32xbf16>, vector<32x256xbf16>, vector<128x256xf32> -> vector<128x256xf32>
    %c0_3 = arith.constant 0 : index
    %c0_4 = arith.constant 0 : index
    %4 = vector.load %arg3[%c0_3, %c0_4] : memref<1x256xf32, #tpu.memory_space<vmem>>, vector<1x256xf32>
    %5 = vector.broadcast %4 : vector<1x256xf32> to vector<128x256xf32>
    %6 = arith.addf %3, %5 : vector<128x256xf32>
    %cst_5 = arith.constant 0.000000e+00 : f32
    %7 = vector.broadcast %cst_5 : f32 to vector<128x256xf32>
    %8 = arith.maximumf %6, %7 : vector<128x256xf32>
    %9 = arith.truncf %8 : vector<128x256xf32> to vector<128x256xbf16>
    %c0_6 = arith.constant 0 : index
    %c0_7 = arith.constant 0 : index
    %10 = vector.load %arg4[%c0_6, %c0_7] : memref<256x256xbf16, #tpu.memory_space<vmem>>, vector<256x256xbf16>
    %cst_8 = arith.constant dense<0.000000e+00> : vector<128x256xf32>
    %11 = tpu.matmul %9, %10, %cst_8 {dimension_numbers = #tpu.dot_dimension_numbers<[1], [0], [0], [1], [0, 0, 1, 1], [], []>} : vector<128x256xbf16>, vector<256x256xbf16>, vector<128x256xf32> -> vector<128x256xf32>
    %12 = vector.extract_strided_slice %11 {offsets = [0, 0], sizes = [128, 128], strides = [1, 1]} : vector<128x256xf32> to vector<128x128xf32>
    %c0_9 = arith.constant 0 : index
    %c0_10 = arith.constant 0 : index
    %13 = vector.load %arg5[%c0_9, %c0_10] : memref<1x128xf32, #tpu.memory_space<vmem>>, vector<1x128xf32>
    %14 = vector.broadcast %13 : vector<1x128xf32> to vector<128x128xf32>
    %15 = arith.addf %12, %14 : vector<128x128xf32>
    %cst_11 = arith.constant 0.000000e+00 : f32
    %16 = vector.broadcast %cst_11 : f32 to vector<128x128xf32>
    %17 = arith.maximumf %15, %16 : vector<128x128xf32>
    %18 = vector.extract_strided_slice %11 {offsets = [0, 128], sizes = [128, 128], strides = [1, 1]} : vector<128x256xf32> to vector<128x128xf32>
    %19 = arith.addf %17, %18 : vector<128x128xf32>
    %20 = arith.truncf %19 : vector<128x128xf32> to vector<128x128xbf16>
    %c0_12 = arith.constant 0 : index
    %c0_13 = arith.constant 0 : index
    %21 = vector.load %arg6[%c0_12, %c0_13] : memref<128x256xbf16, #tpu.memory_space<vmem>>, vector<128x256xbf16>
    %cst_14 = arith.constant dense<0.000000e+00> : vector<128x256xf32>
    %22 = tpu.matmul %20, %21, %cst_14 {dimension_numbers = #tpu.dot_dimension_numbers<[1], [0], [0], [1], [0, 0, 1, 1], [], []>} : vector<128x128xbf16>, vector<128x256xbf16>, vector<128x256xf32> -> vector<128x256xf32>
    %23 = vector.extract_strided_slice %22 {offsets = [0, 0], sizes = [128, 128], strides = [1, 1]} : vector<128x256xf32> to vector<128x128xf32>
    %c0_15 = arith.constant 0 : index
    %c0_16 = arith.constant 0 : index
    %24 = vector.load %arg7[%c0_15, %c0_16] : memref<1x128xf32, #tpu.memory_space<vmem>>, vector<1x128xf32>
    %25 = vector.broadcast %24 : vector<1x128xf32> to vector<128x128xf32>
    %26 = arith.addf %23, %25 : vector<128x128xf32>
    %cst_17 = arith.constant 0.000000e+00 : f32
    %27 = vector.broadcast %cst_17 : f32 to vector<128x128xf32>
    %28 = arith.maximumf %26, %27 : vector<128x128xf32>
    %29 = vector.extract_strided_slice %22 {offsets = [0, 128], sizes = [128, 128], strides = [1, 1]} : vector<128x256xf32> to vector<128x128xf32>
    %30 = arith.addf %28, %29 : vector<128x128xf32>
    %c0_18 = arith.constant 0 : index
    %c0_19 = arith.constant 0 : index
    %31 = vector.load %arg8[%c0_18, %c0_19] : memref<1x128xf32, #tpu.memory_space<vmem>>, vector<1x128xf32>
    %32 = vector.broadcast %31 : vector<1x128xf32> to vector<128x128xf32>
    %33 = arith.addf %30, %32 : vector<128x128xf32>
    %34 = arith.truncf %33 : vector<128x128xf32> to vector<128x128xbf16>
    %c0_20 = arith.constant 0 : index
    %c0_21 = arith.constant 0 : index
    %35 = vector.load %arg9[%c0_20, %c0_21] : memref<128x128xbf16, #tpu.memory_space<vmem>>, vector<128x128xbf16>
    %cst_22 = arith.constant dense<0.000000e+00> : vector<128x128xf32>
    %36 = tpu.matmul %34, %35, %cst_22 {dimension_numbers = #tpu.dot_dimension_numbers<[1], [0], [0], [1], [0, 0, 1, 1], [], []>} : vector<128x128xbf16>, vector<128x128xbf16>, vector<128x128xf32> -> vector<128x128xf32>
    %37 = vector.extract_strided_slice %36 {offsets = [0, 0], sizes = [128, 64], strides = [1, 1]} : vector<128x128xf32> to vector<128x64xf32>
    %c0_23 = arith.constant 0 : index
    %c0_24 = arith.constant 0 : index
    %38 = vector.load %arg10[%c0_23, %c0_24] : memref<1x64xf32, #tpu.memory_space<vmem>>, vector<1x64xf32>
    %39 = vector.broadcast %38 : vector<1x64xf32> to vector<128x64xf32>
    %40 = arith.addf %37, %39 : vector<128x64xf32>
    %cst_25 = arith.constant 0.000000e+00 : f32
    %41 = vector.broadcast %cst_25 : f32 to vector<128x64xf32>
    %42 = arith.maximumf %40, %41 : vector<128x64xf32>
    %43 = vector.extract_strided_slice %36 {offsets = [0, 64], sizes = [128, 64], strides = [1, 1]} : vector<128x128xf32> to vector<128x64xf32>
    %44 = arith.addf %42, %43 : vector<128x64xf32>
    %45 = arith.truncf %44 : vector<128x64xf32> to vector<128x64xbf16>
    %c0_26 = arith.constant 0 : index
    %c0_27 = arith.constant 0 : index
    %46 = vector.load %arg11[%c0_26, %c0_27] : memref<64x32xbf16, #tpu.memory_space<vmem>>, vector<64x32xbf16>
    %cst_28 = arith.constant dense<0.000000e+00> : vector<128x32xf32>
    %47 = tpu.matmul %45, %46, %cst_28 {dimension_numbers = #tpu.dot_dimension_numbers<[1], [0], [0], [1], [0, 0, 1, 1], [], []>} : vector<128x64xbf16>, vector<64x32xbf16>, vector<128x32xf32> -> vector<128x32xf32>
    %48 = vector.extract_strided_slice %47 {offsets = [0, 0], sizes = [128, 16], strides = [1, 1]} : vector<128x32xf32> to vector<128x16xf32>
    %c0_29 = arith.constant 0 : index
    %c0_30 = arith.constant 0 : index
    %49 = vector.load %arg12[%c0_29, %c0_30] : memref<1x16xf32, #tpu.memory_space<vmem>>, vector<1x16xf32>
    %50 = vector.broadcast %49 : vector<1x16xf32> to vector<128x16xf32>
    %51 = arith.addf %48, %50 : vector<128x16xf32>
    %cst_31 = arith.constant 0.000000e+00 : f32
    %52 = vector.broadcast %cst_31 : f32 to vector<128x16xf32>
    %53 = arith.maximumf %51, %52 : vector<128x16xf32>
    %54 = vector.extract_strided_slice %47 {offsets = [0, 16], sizes = [128, 16], strides = [1, 1]} : vector<128x32xf32> to vector<128x16xf32>
    %55 = arith.addf %53, %54 : vector<128x16xf32>
    %c0_32 = arith.constant 0 : index
    %c0_33 = arith.constant 0 : index
    %56 = vector.load %arg13[%c0_32, %c0_33] : memref<1x16xf32, #tpu.memory_space<vmem>>, vector<1x16xf32>
    %57 = vector.broadcast %56 : vector<1x16xf32> to vector<128x16xf32>
    %58 = arith.mulf %55, %57 : vector<128x16xf32>
    %cst_34 = arith.constant dense<0.000000e+00> : vector<128xf32>
    %59 = vector.multi_reduction <add>, %58, %cst_34 [1] : vector<128x16xf32> to vector<128xf32>
    %60 = vector.shape_cast %59 : vector<128xf32> to vector<128x1xf32>
    %c0_35 = arith.constant 0 : index
    %c0_36 = arith.constant 0 : index
    %61 = vector.load %arg14[%c0_35, %c0_36] : memref<1x1xf32, #tpu.memory_space<vmem>>, vector<1x1xf32>
    %62 = vector.broadcast %61 : vector<1x1xf32> to vector<128x1xf32>
    %63 = arith.addf %60, %62 : vector<128x1xf32>
    %64 = vector.shape_cast %63 : vector<128x1xf32> to vector<1x1x128xf32>
    %c0_37 = arith.constant 0 : index
    %c0_38 = arith.constant 0 : index
    %c0_39 = arith.constant 0 : index
    %65 = vector.load %arg15[%c0_37, %c0_38, %c0_39] : memref<1x1x128xf32, #tpu.memory_space<vmem>>, vector<1x1x128xf32>
    tpu.vector_store %arg15[%c0_37, %c0_38, %c0_39], %64 {strides = array<i32>} : memref<1x1x128xf32, #tpu.memory_space<vmem>>, vector<1x1x128xf32>,
    return
  }
  func.func @transform_0(%arg0: i32) -> (i32, i32) {
    %c0_i32 = arith.constant 0 : i32
    %c0_i32_0 = arith.constant 0 : i32
    return %arg0, %c0_i32 : i32, i32
  }
  func.func @transform_1(%arg0: i32) -> (i32, i32) {
    %c0_i32 = arith.constant 0 : i32
    %c0_i32_0 = arith.constant 0 : i32
    %c0_i32_1 = arith.constant 0 : i32
    return %c0_i32, %c0_i32_0 : i32, i32
  }
  func.func @transform_2(%arg0: i32) -> (i32, i32) {
    %c0_i32 = arith.constant 0 : i32
    %c0_i32_0 = arith.constant 0 : i32
    %c0_i32_1 = arith.constant 0 : i32
    return %c0_i32, %c0_i32_0 : i32, i32
  }
  func.func @transform_3(%arg0: i32) -> (i32, i32) {
    %c0_i32 = arith.constant 0 : i32
    %c0_i32_0 = arith.constant 0 : i32
    %c0_i32_1 = arith.constant 0 : i32
    return %c0_i32, %c0_i32_0 : i32, i32
  }
  func.func @transform_4(%arg0: i32) -> (i32, i32) {
    %c0_i32 = arith.constant 0 : i32
    %c0_i32_0 = arith.constant 0 : i32
    %c0_i32_1 = arith.constant 0 : i32
    return %c0_i32, %c0_i32_0 : i32, i32
  }
  func.func @transform_5(%arg0: i32) -> (i32, i32) {
    %c0_i32 = arith.constant 0 : i32
    %c0_i32_0 = arith.constant 0 : i32
    %c0_i32_1 = arith.constant 0 : i32
    return %c0_i32, %c0_i32_0 : i32, i32
  }
  func.func @transform_6(%arg0: i32) -> (i32, i32) {
    %c0_i32 = arith.constant 0 : i32
    %c0_i32_0 = arith.constant 0 : i32
    %c0_i32_1 = arith.constant 0 : i32
    return %c0_i32, %c0_i32_0 : i32, i32
  }
  func.func @transform_7(%arg0: i32) -> (i32, i32) {
    %c0_i32 = arith.constant 0 : i32
    %c0_i32_0 = arith.constant 0 : i32
    %c0_i32_1 = arith.constant 0 : i32
    return %c0_i32, %c0_i32_0 : i32, i32
  }
  func.func @transform_8(%arg0: i32) -> (i32, i32) {
    %c0_i32 = arith.constant 0 : i32
    %c0_i32_0 = arith.constant 0 : i32
    %c0_i32_1 = arith.constant 0 : i32
    return %c0_i32, %c0_i32_0 : i32, i32
  }
  func.func @transform_9(%arg0: i32) -> (i32, i32) {
    %c0_i32 = arith.constant 0 : i32
    %c0_i32_0 = arith.constant 0 : i32
    %c0_i32_1 = arith.constant 0 : i32
    return %c0_i32, %c0_i32_0 : i32, i32
  }
  func.func @transform_10(%arg0: i32) -> (i32, i32) {
    %c0_i32 = arith.constant 0 : i32
    %c0_i32_0 = arith.constant 0 : i32
    %c0_i32_1 = arith.constant 0 : i32
    return %c0_i32, %c0_i32_0 : i32, i32
  }
  func.func @transform_11(%arg0: i32) -> (i32, i32) {
    %c0_i32 = arith.constant 0 : i32
    %c0_i32_0 = arith.constant 0 : i32
    %c0_i32_1 = arith.constant 0 : i32
    return %c0_i32, %c0_i32_0 : i32, i32
  }
  func.func @transform_12(%arg0: i32) -> (i32, i32) {
    %c0_i32 = arith.constant 0 : i32
    %c0_i32_0 = arith.constant 0 : i32
    %c0_i32_1 = arith.constant 0 : i32
    return %c0_i32, %c0_i32_0 : i32, i32
  }
  func.func @transform_13(%arg0: i32) -> (i32, i32) {
    %c0_i32 = arith.constant 0 : i32
    %c0_i32_0 = arith.constant 0 : i32
    %c0_i32_1 = arith.constant 0 : i32
    return %c0_i32, %c0_i32_0 : i32, i32
  }
  func.func @transform_14(%arg0: i32) -> (i32, i32, i32) {
    %c0_i32 = arith.constant 0 : i32
    %c0_i32_0 = arith.constant 0 : i32
    %c0_i32_1 = arith.constant 0 : i32
    return %arg0, %c0_i32, %c0_i32_0 : i32, i32, i32
  }
}

</mosaic_0001>

<bundles_post_ra>
// kernel: tpu_custom_call.1
= control target key start
LH: loop header
LB: loop body
LE: loop exit
PB: predicated region body
PF: predicated region fallthrough
CT: control target
= control target key end

     0   :  { %s3808_s0 = inlined_call_operand.vmem [shape: f32[256,32], index: 0, kind: input, shape index: {}]   ;;  %s3809_s1 = inlined_call_operand.hbm [shape: bf16[32,256], index: 1, kind: input, shape index: {}]   ;;  %s3810_s2 = inlined_call_operand.vmem [shape: f32[1,256], index: 2, kind: input, shape index: {}]   ;;  %s3811_s3 = inlined_call_operand.vmem [shape: bf16[256,256], index: 3, kind: input, shape index: {}]   ;;  %s3812_s4 = inlined_call_operand.hbm [shape: f32[1,128], index: 4, kind: input, shape index: {}]   ;;  %s3813_s5 = inlined_call_operand.vmem [shape: bf16[128,256], index: 5, kind: input, shape index: {}]   ;;  %s3814_s6 = inlined_call_operand.hbm [shape: f32[1,128], index: 6, kind: input, shape index: {}]   ;;  %s3815_s7 = inlined_call_operand.hbm [shape: f32[1,128], index: 7, kind: input, shape index: {}]   ;;  %s3816_s8 = inlined_call_operand.hbm [shape: bf16[128,128], index: 8, kind: input, shape index: {}]   ;;  %s3817_s9 = inlined_call_operand.vmem [shape: f32[1,64], index: 9, kind: input, shape index: {}]   ;;  %s3818_s10 = inlined_call_operand.vmem [shape: bf16[64,32], index: 10, kind: input, shape index: {}]   ;;  %s3819_s11 = inlined_call_operand.vmem [shape: f32[1,16], index: 11, kind: input, shape index: {}]   ;;  %s3820_s12 = inlined_call_operand.vmem [shape: f32[1,16], index: 12, kind: input, shape index: {}]   ;;  %s3821_s13 = inlined_call_operand.<no memory space> [shape: f32[1,1], index: 13, kind: input, shape index: {}]   ;;  %s3822_s14 = inlined_call_operand.hbm [shape: f32[2,1,128], index: 14, kind: output, shape index: {}]  }
   0x1   :  { %3836 = sst [smem:[#allocation25_spill]] %s3812_s4  ;;  %v19_v0 = vstv %s3821_s13 }
   0x2   :  { %3837 = sst [smem:[#allocation26_spill]] %s3815_s7  ;;  %20 = vst [vmem:[#allocation2] sm:$0x1] %v19_v0 }
   0x3   :  { %3838 = sst [smem:[#allocation27_spill]] %s3822_s14 }
   0x4   :  { %21 = vsyncpa [#allocation4], 0 }
   0x5   :  { %22 = vsyncpa [#allocation7], 0 }
   0x6   :  { %23 = vsyncpa [#allocation10], 0 }
   0x7   :  { %24 = vsyncpa [#allocation5], 0 }
   0x8   :  { %26 = vsyncpa [#allocation5 + $0x1], 0  ;;  %s3083_s15 = smov 0   ;;  %s3085_s16 = smov 0  }
   0x9   :  { %s3087_s17 = smov 0   ;;  %s3089_s18 = smov 0  }
   0xa LB: > { %3839 = sst [smem:[#allocation17_spill]] %s2978_s15  ;;  %s3104_s13 = sadd.s32 4294967295, %s2990_s18   ;;  %s2990_s18 = sphi %s3089_s18, %s3869_s18   ;;  %s2986_s17 = sphi %s3087_s17, %s3872_s17   ;;  %s2982_s16 = sphi %s3085_s16, %s3871_s16   ;;  %s2978_s15 = sphi %s3083_s15, %s3870_s15  }
   0xb   : > { %3840 = sst [smem:[#allocation18_spill]] %s2982_s16  ;;  %s2397_s19 = sadd.s32 4294967294, %s2990_s18  }
   0xc   : > { %3841 = sst [smem:[#allocation19_spill]] %s2986_s17  ;;  %s3108_s20 = sadd.s32 1, %s2990_s18  }
   0xd   : > { %3842 = sst [smem:[#allocation20_spill]] %s2990_s18  ;;  %s338_s21 = sadd.s32 1, %s2986_s17 }
   0xe   : > { %3843 = sst [smem:[#allocation21_spill]] %s3108_s20  ;;  %s335_s22 = ssub.s32 %s2990_s18, %s3108_s20 }
   0xf   : > { %p348_p0 = scmp.ne.s32.totalorder %s2986_s17, %s2982_s16  ;;  %p336_p1 = scmp.eq.s32.totalorder %s335_s22, 0 }
  0x10   : > { %p349_p2 = scmp.eq.s32.totalorder %s3104_s13, 1  ;;  %p354_p3 = scmp.ne.s32.totalorder %s2982_s16, %s2978_s15 }
  0x11   : > { %p355_p4 = scmp.eq.s32.totalorder %s2397_s19, 1  ;;  %p2398_p7 = scmp.ge.s32.totalorder %s2990_s18, 1 }
  0x12   : > { %s3119_s23 = scalar_select %p336_p1, %s2986_s17, %s338_s21  }
  0x13   : > { %p3121_p5 = por %p349_p2, %p348_p0  ;;  %p3125_p6 = por %p355_p4, %p354_p3 }
  0x14   : > { %3844 = sst [smem:[#allocation22_spill]] %s3119_s23  ;;  %p362_p8 = scmp.lt.s32.totalorder %s2990_s18, 3 }
  0x15   : > { %s3845_s24 = scalar_select %p3121_p5, 1, 0 }
  0x16   : > { %s3847_s25 = scalar_select %p3125_p6, 1, 0 }
  0x17   : > { %3846 = sst [smem:[#allocation23_spill]] %s3845_s24  ;;  %p3828_p9 = scmp.eq.s32.totalorder %s3104_s13, 0 }
  0x18   : > { %3848 = sst [smem:[#allocation24_spill]] %s3847_s25  ;;  %p3132_p10 = pnand %p2398_p7, %p362_p8 }
  0x19   : > { %s2992_s27 = smov [#allocation6]   ;;  %s2993_s29 = smov [#allocation9]  }
  0x1a   : > { %s3849_s26 = scalar_select %p3132_p10, 1, 0 }
  0x1b   : > { %s394_s28 = sshll.u32 %s2992_s27, 4  ;;  %p2609_p11 = pneg %p3132_p10  ;;  %s395_s28 = int_to_ptr.vmem [resolvable:$true] %s394_s28 }
  0x1c   : > { %s419_s30 = sshll.u32 %s2993_s29, 4  ;;  %s2994_s21 = smov [#allocation3]   ;;  %s3144_s30 = int_to_ptr.vmem [resolvable:$true] %s419_s30 }
  0x1d   : > { %p3140_p12 = pnand %p3828_p9, %p2609_p11  ;;  %s374_s22 = sshll.u32 %s2994_s21, 4  ;;  %s3146_s22 = int_to_ptr.vmem [resolvable:$true] %s374_s22 }
  0x1e   : > { %s3851_s4 = sld [smem:[#allocation25_spill]] }
  0x1f   : > { %p3156_p0 = pneg %p3140_p12 }
  0x24   : > { %s2776_s27 = scalar_lea.hbm %s3851_s4, 16 }
  0x25   : > { %p2777_p13 = scmp.ne.s32.totalorder %s3851_s4, %s2776_s27  ;;  %p2783_p3 = scmp.lt.u32.totalorder %s2776_s27, %s3851_s4 }
  0x27   : > { %p2779_p1 = pnand %p3156_p0, %p2777_p13 }
  0x29   : > { %p2780_p2 = pneg %p2779_p1 }
  0x2b   : > { %p2785_p4 = pnand %p2783_p3, %p2780_p2 }
  0x2d   : > { %2788 = shalt.err (!%p2785_p4)
}
  0x2e   : > { %s2789_s17 = scalar_lea.vmem %s395_s28, 16  ;;  %s2796_s20 = scalar_lea.vmem %s395_s28, 32 }
  0x2f   : > { %p2790_p7 = scmp.ne.s32.totalorder %s395_s28, %s2789_s17  ;;  %p2797_p9 = scmp.lt.s32.totalorder %s395_s28, %s395_s28 }
  0x30   : > { %p2798_p6 = scmp.lt.s32.totalorder %s2796_s20, %s2789_s17 }
  0x31   : > { %p2792_p8 = pnand %p2790_p7, %p3156_p0 }
  0x32   : > { %p2799_p5 = por %p2798_p6, %p2797_p9 }
  0x33   : > { %p2793_p11 = pneg %p2792_p8 }
  0x35   : > { %p2800_p10 = pnand %p2799_p5, %p2793_p11 }
  0x37   : > { %2803 = shalt.err (!%p2800_p10)
}
  0x38   : > { %2615 = dma.hbm_to_vmem [thread:$0]  (!%p3140_p12), %s3851_s4, 16, %s395_s28, [#allocation7]  }
  0x39   : > { %s3853_s7 = sld [smem:[#allocation26_spill]] }
  0x3f   : > { %s2804_s21 = scalar_lea.hbm %s3853_s7, 16 }
  0x40   : > { %p2805_p13 = scmp.ne.s32.totalorder %s3853_s7, %s2804_s21  ;;  %p2811_p5 = scmp.lt.u32.totalorder %s2804_s21, %s3853_s7 }
  0x42   : > { %p2807_p1 = pnand %p2805_p13, %p3156_p0 }
  0x44   : > { %p2808_p6 = pneg %p2807_p1 }
  0x46   : > { %p2813_p9 = pnand %p2811_p5, %p2808_p6 }
  0x48   : > { %2816 = shalt.err (!%p2813_p9)
}
  0x49   : > { %s2817_s28 = scalar_lea.vmem %s3144_s30, 16  ;;  %s2824_s14 = scalar_lea.vmem %s3144_s30, 32 }
  0x4a   : > { %p2818_p10 = scmp.ne.s32.totalorder %s3144_s30, %s2817_s28  ;;  %p2825_p4 = scmp.lt.s32.totalorder %s3144_s30, %s3144_s30 }
  0x4b   : > { %p2826_p7 = scmp.lt.s32.totalorder %s2824_s14, %s2817_s28 }
  0x4c   : > { %p2820_p2 = pnand %p2818_p10, %p3156_p0 }
  0x4d   : > { %p2827_p8 = por %p2826_p7, %p2825_p4 }
  0x4e   : > { %p2821_p3 = pneg %p2820_p2 }
  0x50   : > { %p2828_p11 = pnand %p2827_p8, %p2821_p3 }
  0x52   : > { %2831 = shalt.err (!%p2828_p11)
}
  0x53   : > { %2621 = dma.hbm_to_vmem [thread:$0]  (!%p3140_p12), %s3853_s7, 16, %s3144_s30, [#allocation10]  }
  0x54   : > { %s2832_s27 = scalar_lea.hbm %s3809_s1, 512 }
  0x55   : > { %p2833_p13 = scmp.ne.s32.totalorder %s3809_s1, %s2832_s27  ;;  %p2839_p5 = scmp.lt.u32.totalorder %s2832_s27, %s3809_s1 }
  0x57   : > { %p2835_p1 = pnand %p2833_p13, %p3156_p0 }
  0x59   : > { %p2836_p6 = pneg %p2835_p1 }
  0x5b   : > { %p2841_p9 = pnand %p2839_p5, %p2836_p6 }
  0x5d   : > { %2844 = shalt.err (!%p2841_p9)
}
  0x5e   : > { %s2845_s30 = scalar_lea.vmem %s3146_s22, 512  ;;  %p2853_p4 = scmp.lt.s32.totalorder %s3146_s22, %s3146_s22 }
  0x5f   : > { %p2846_p10 = scmp.ne.s32.totalorder %s3146_s22, %s2845_s30  ;;  %p2854_p7 = scmp.lt.s32.totalorder %s2845_s30, %s2845_s30 }
  0x61   : > { %p2848_p2 = pnand %p2846_p10, %p3156_p0  ;;  %p2855_p8 = por %p2854_p7, %p2853_p4 }
  0x63   : > { %p2849_p3 = pneg %p2848_p2 }
  0x65   : > { %p2856_p11 = pnand %p2855_p8, %p2849_p3 }
  0x67   : > { %2859 = shalt.err (!%p2856_p11)
}
  0x68   : > { %s2995_s14 = smov 128   ;;  %s2996_s18 = smov 8  }
  0x69   : > { %2612 = dma.hbm_to_vmem [thread:$0]  (!%p3140_p12), %s3809_s1, 512, %s3146_s22, [#allocation4], %s2995_s14, %s2995_s14, %s2996_s18  }
  0x6a   : > { %s2997_s15 = smov [#allocation8]   ;;  %s2998_s21 = smov [#allocation11]  }
  0x6b   : > { %s408_s27 = sshll.u32 %s2997_s15, 4  ;;  %s429_s17 = sshll.u32 %s2998_s21, 4  ;;  %s409_s27 = int_to_ptr.vmem [resolvable:$true] %s408_s27  ;;  %s430_s17 = int_to_ptr.vmem [resolvable:$true] %s429_s17 }
  0x6c   : > { %s2860_s30 = scalar_lea.hbm %s3814_s6, 16 }
  0x6d   : > { %p2861_p13 = scmp.ne.s32.totalorder %s3814_s6, %s2860_s30  ;;  %p2867_p5 = scmp.lt.u32.totalorder %s2860_s30, %s3814_s6 }
  0x6f   : > { %p2863_p1 = pnand %p2861_p13, %p3156_p0 }
  0x71   : > { %p2864_p6 = pneg %p2863_p1 }
  0x73   : > { %p2869_p9 = pnand %p2867_p5, %p2864_p6 }
  0x75   : > { %2872 = shalt.err (!%p2869_p9)
}
  0x76   : > { %s2873_s22 = scalar_lea.vmem %s409_s27, 16  ;;  %s2880_s14 = scalar_lea.vmem %s409_s27, 32 }
  0x77   : > { %p2874_p10 = scmp.ne.s32.totalorder %s409_s27, %s2873_s22  ;;  %p2881_p4 = scmp.lt.s32.totalorder %s409_s27, %s409_s27 }
  0x78   : > { %p2882_p7 = scmp.lt.s32.totalorder %s2880_s14, %s2873_s22 }
  0x79   : > { %p2876_p2 = pnand %p2874_p10, %p3156_p0 }
  0x7a   : > { %p2883_p8 = por %p2882_p7, %p2881_p4 }
  0x7b   : > { %p2877_p3 = pneg %p2876_p2 }
  0x7d   : > { %p2884_p11 = pnand %p2883_p8, %p2877_p3 }
  0x7f   : > { %2887 = shalt.err (!%p2884_p11)
}
  0x80   : > { %2618 = dma.hbm_to_vmem [thread:$0]  (!%p3140_p12), %s3814_s6, 16, %s409_s27, [#allocation7]  }
  0x81   : > { %s2888_s18 = scalar_lea.hbm %s3816_s8, 1024 }
  0x82   : > { %p2889_p13 = scmp.ne.s32.totalorder %s3816_s8, %s2888_s18  ;;  %p2895_p5 = scmp.lt.u32.totalorder %s2888_s18, %s3816_s8 }
  0x84   : > { %p2891_p1 = pnand %p2889_p13, %p3156_p0 }
  0x86   : > { %p2892_p6 = pneg %p2891_p1 }
  0x88   : > { %p2897_p9 = pnand %p2895_p5, %p2892_p6 }
  0x8a   : > { %2900 = shalt.err (!%p2897_p9)
}
  0x8b   : > { %s2901_s20 = scalar_lea.vmem %s430_s17, 1024  ;;  %p2909_p4 = scmp.lt.s32.totalorder %s430_s17, %s430_s17 }
  0x8c   : > { %p2902_p10 = scmp.ne.s32.totalorder %s430_s17, %s2901_s20  ;;  %p2910_p7 = scmp.lt.s32.totalorder %s2901_s20, %s2901_s20 }
  0x8e   : > { %p2904_p2 = pnand %p2902_p10, %p3156_p0  ;;  %p2911_p8 = por %p2910_p7, %p2909_p4 }
  0x90   : > { %p2905_p3 = pneg %p2904_p2 }
  0x92   : > { %p2912_p11 = pnand %p2911_p8, %p2905_p3 }
  0x94   : > { %2915 = shalt.err (!%p2912_p11)
}
  0x95   : > { %s2999_s27 = smov 64   ;;  %s3000_s28 = smov 4  }
  0x96   : > { %2624 = dma.hbm_to_vmem [thread:$0]  (!%p3140_p12), %s3816_s8, 1024, %s430_s17, [#allocation10], %s2999_s27, %s2999_s27, %s3000_s28  }
  0x97   : > { %p3854_p13 = scmp.ne.s32.totalorder %s3849_s26, 0 }
  0x98   : > { %p3855_p1 = scmp.eq.s32.totalorder (!%p3854_p13), %s3104_s13, 0 }
  0x99   : > { %469 = sbr.rel (%p3854_p13) target bundleno = 1875 (0x753), region = 76 }
  0xa0   : > { %2961 = dma.done.wait (%p3855_p1), [#allocation4], 512   ;;  %p3856_p0 = pmov %p3855_p1 }
  0xa2   : > { %2963 = vsyncadd (%p3856_p0), [#allocation4], 4294966784  ;;  %p3857_p6 = pmov %p3856_p0 }
  0xa3   : > { %p3858_p5 = pmov %p3856_p0 }
  0xa4   : > { %2965 = dma.done.wait (%p3857_p6), [#allocation7], 32  }
  0xa5   : > { %2967 = vsyncadd (%p3858_p5), [#allocation7], 4294967264  ;;  %p3859_p9 = pmov %p3856_p0 }
  0xa6   : > { %p3860_p12 = pmov %p3856_p0 }
  0xa7   : > { %2969 = dma.done.wait (%p3859_p9), [#allocation10], 1040  }
  0xa8   : > { %2971 = vsyncadd (%p3860_p12), [#allocation10], 4294966256  ;;  %s3270_s26 = sshll.u32 %s3104_s13, 4  ;;  %v3001_v1 = vmov 0   ;;  %v2686_v2 = vld [vmem:[#allocation3 + $0x4] ss:$8 sps:$4 sm:$0xff]  }
  0xa9   : > { %654 = vmatprep.mubr.bf16.mxu0 %v3001_v1  ;;  %p531_p10 = scmp.lt.s32.totalorder %s3270_s26, 31  ;;  %2684 = vset.pattern.permute.xlu1 %v3001_v1  ;;  %v2688_v3 = vld [vmem:[#allocation3] ss:$8 sps:$4 sm:$0xff]   ;;  %v2689_v4 = vld [vmem:[#allocation3 + $0x14] ss:$8 sps:$4 sm:$0xff]   ;;  %vm597_vm0 = vcmask 261120  }
  0xaa   : > { %2685 = vset.pattern.permute.xlu0 %v3001_v1  ;;  %622 = vmatprep.subr.bf16.mxu0 %v2686_v2  ;;  %v2691_v5 = vld [vmem:[#allocation3 + $0x10] ss:$8 sps:$4 sm:$0xff]   ;;  %v2692_v9 = vld [vmem:[%s3811_s3 + $0x4] ss:$8 sps:$4 sm:$0xff]   ;;  %v2694_v10 = vld [vmem:[%s3811_s3] ss:$8 sps:$4 sm:$0xff]  }
  0xab   : > { %s532_s19 = scalar_select %p531_p10, %s3270_s26, 31  ;;  %623 = vmatpush1.bf16.msra.mxu0 %v2688_v3  ;;  %975 = vmatprep.subr.bf16.mxu1 %v2692_v9  ;;  %v2695_v12 = vld [vmem:[%s3811_s3 + $0x14] ss:$8 sps:$4 sm:$0xff]   ;;  %v2697_v14 = vld [vmem:[%s3811_s3 + $0x10] ss:$8 sps:$4 sm:$0xff]   ;;  %vm1766_vm1 = vcmask 523264  }
  0xac   : > { %624 = vmatprep.subr.bf16.mxu0 %v2689_v4  ;;  %976 = vmatpush1.bf16.msra.mxu1 %v2694_v10  ;;  %v2698_v15 = vld [vmem:[%s3811_s3 + $0x24] ss:$8 sps:$4 sm:$0xff]   ;;  %v2700_v17 = vld [vmem:[%s3811_s3 + $0x20] ss:$8 sps:$4 sm:$0xff]   ;;  %v2701_v18 = vld [vmem:[%s3811_s3 + $0x34] ss:$8 sps:$4 sm:$0xff]  }
  0xad   : > { %s2412_s29 = sshll.u32 %s532_s19, 3  ;;  %977 = vmatprep.subr.bf16.mxu1 %v2695_v12  ;;  %v2703_v21 = vld [vmem:[%s3811_s3 + $0x30] ss:$8 sps:$4 sm:$0xff]   ;;  %v2704_v22 = vld [vmem:[%s3811_s3 + $0x44] ss:$8 sps:$4 sm:$0xff]   ;;  %s3002_s22 = smov 64  }
  0xae   : > { %s3280_s4 = scalar_lea.vmem %s3808_s0, %s2412_s29  ;;  %v2706_v24 = vld [vmem:[%s3811_s3 + $0x40] ss:$8 sps:$4 sm:$0xff]   ;;  %v2707_v25 = vld [vmem:[%s3811_s3 + $0x54] ss:$8 sps:$4 sm:$0xff]   ;;  %v2709_v28 = vld [vmem:[%s3811_s3 + $0x50] ss:$8 sps:$4 sm:$0xff]  }
  0xaf   : > { %v537_v6 = vld [vmem:[%s3280_s4] sm:$0xff]  ;;  %v538_v7 = vld [vmem:[%s3280_s4 + $0x8] sm:$0xff]  ;;  %625 = vmatpush1.bf16.msra.mxu0 %v2691_v5  ;;  %v539_v11 = vld [vmem:[%s3280_s4 + $0x10] sm:$0xff]  ;;  %s3003_s17 = smov 112   ;;  %vm2030_vm2 = vcmask 130048   ;;  %vm2177_vm3 = vcmask 130112  }
  0xb0   : > { %v553_v8 = vpack.c.bf16 %v538_v7, %v537_v6  ;;  %v540_v13 = vld [vmem:[%s3280_s4 + $0x18] sm:$0xff]  ;;  %978 = vmatpush1.bf16.msra.mxu1 %v2697_v14  ;;  %v541_v19 = vld [vmem:[%s3280_s4 + $0x20] sm:$0xff]  ;;  %v542_v20 = vld [vmem:[%s3280_s4 + $0x28] sm:$0xff]  ;;  %vm2184_vm4 = vcmask 195712   ;;  %vm2191_vm5 = vcmask 261312   ;;  %vm2198_vm6 = vcmask 326912  }
  0xb1   : > { %v554_v16 = vpack.c.bf16 %v540_v13, %v539_v11  ;;  %979 = vmatprep.subr.bf16.mxu1 %v2698_v15  ;;  %v555_v23 = vpack.c.bf16 %v542_v20, %v541_v19  ;;  %v543_v26 = vld [vmem:[%s3280_s4 + $0x30] sm:$0xff]  ;;  %v544_v27 = vld [vmem:[%s3280_s4 + $0x38] sm:$0xff]  ;;  %v2710_v29 = vld [vmem:[%s3811_s3 + $0x64] ss:$8 sps:$4 sm:$0xff]   ;;  %v567_v13 = vlaneseq  ;;  %vm2205_vm7 = vcmask 392512   ;;  %s3861_s24 = sld [smem:[#allocation18_spill]] }
  0xb2   : > { %2417 = vmatmul.mubr.msk.bf16.vlgmr.msra.gmra.mrb[0].mxu0 %vm597_vm0, %v553_v8  ;;  %v2712_v30 = vld [vmem:[%s3811_s3 + $0x60] ss:$8 sps:$4 sm:$0xff]   ;;  %v556_v31 = vpack.c.bf16 %v544_v27, %v543_v26  ;;  %v2713_v32 = vld [vmem:[%s3811_s3 + $0x74] ss:$8 sps:$4 sm:$0xff]   ;;  %v2715_v35 = vld [vmem:[%s3811_s3 + $0x70] ss:$8 sps:$4 sm:$0xff]  }
  0xb3   : > { %664 = vmatprep.mubr.bf16.mxu0 %v3001_v1  ;;  %v545_v33 = vld [vmem:[%s3280_s4 + $0x40] sm:$0xff]  ;;  %v546_v34 = vld [vmem:[%s3280_s4 + $0x48] sm:$0xff]  ;;  %v2719_v39 = vld [vmem:[%s3811_s3 + $0x94] ss:$8 sps:$4 sm:$0xff]   ;;  %v3453_v14 = vshrl.u32 %v567_v13, 7  ;;  %vm2212_vm8 = vcmask 458112  }
  0xb4   : > { %980 = vmatpush1.bf16.msra.mxu1 %v2700_v17  ;;  %v2716_v36 = vld [vmem:[%s3811_s3 + $0x84] ss:$8 sps:$4 sm:$0xff]   ;;  %v2718_v37 = vld [vmem:[%s3811_s3 + $0x80] ss:$8 sps:$4 sm:$0xff]   ;;  %v557_v38 = vpack.c.bf16 %v546_v34, %v545_v33  ;;  %v547_v40 = vld [vmem:[%s3280_s4 + $0x50] sm:$0xff]  ;;  %vm2219_vm9 = vcmask 523712  }
  0xb5   : > { %981 = vmatprep.subr.bf16.mxu1 %v2701_v18  ;;  %v548_v41 = vld [vmem:[%s3280_s4 + $0x58] sm:$0xff]  ;;  %v2722_v43 = vld [vmem:[%s3811_s3 + $0xa4] ss:$8 sps:$4 sm:$0xff]   ;;  %v2724_v45 = vld [vmem:[%s3811_s3 + $0xa0] ss:$8 sps:$4 sm:$0xff]   ;;  %v569_v15 = vsub.s32 0, %v3453_v14 }
  0xb6   : > { %v2721_v42 = vld [vmem:[%s3811_s3 + $0x90] ss:$8 sps:$4 sm:$0xff]   ;;  %v558_v44 = vpack.c.bf16 %v548_v41, %v547_v40  ;;  %v2725_v46 = vld [vmem:[%s3811_s3 + $0xb4] ss:$8 sps:$4 sm:$0xff]   ;;  %v549_v47 = vld [vmem:[%s3280_s4 + $0x60] sm:$0xff]  ;;  %v573_v17 = vsub.s32 1, %v3453_v14 }
  0xb7   : > { %v550_v48 = vld [vmem:[%s3280_s4 + $0x68] sm:$0xff]  ;;  %v2727_v49 = vld [vmem:[%s3811_s3 + $0xb0] ss:$8 sps:$4 sm:$0xff]   ;;  %v2731_v53 = vld [vmem:[%s3811_s3 + $0xd4] ss:$8 sps:$4 sm:$0xff]   ;;  %vm2226_vm10 = vcmask 589312  }
  0xb8   : > { %982 = vmatpush1.bf16.msra.mxu1 %v2703_v21  ;;  %v2728_v50 = vld [vmem:[%s3811_s3 + $0xc4] ss:$8 sps:$4 sm:$0xff]   ;;  %v559_v51 = vpack.c.bf16 %v550_v48, %v549_v47  ;;  %v2730_v52 = vld [vmem:[%s3811_s3 + $0xc0] ss:$8 sps:$4 sm:$0xff]   ;;  %v551_v54 = vld [vmem:[%s3280_s4 + $0x70] sm:$0xff]  ;;  %vm2233_vm11 = vcmask 654912  }
  0xb9   : > { %983 = vmatprep.subr.bf16.mxu1 %v2704_v22  ;;  %v552_v55 = vld [vmem:[%s3280_s4 + $0x78] sm:$0xff]  ;;  %v2734_v58 = vld [vmem:[%s3811_s3 + $0xe4] ss:$8 sps:$4 sm:$0xff]   ;;  %v2736_v59 = vld [vmem:[%s3811_s3 + $0xe0] ss:$8 sps:$4 sm:$0xff]   ;;  %vm2240_vm12 = vcmask 720512  }
  0xba   : > { %2418 = vmatmul.mubr.msk.bf16.gmra.mrb[4].mxu0 %vm597_vm0, %v554_v16  ;;  %v560_v56 = vpack.c.bf16 %v552_v55, %v551_v54  ;;  %v2733_v57 = vld [vmem:[%s3811_s3 + $0xd0] ss:$8 sps:$4 sm:$0xff]   ;;  %v2737_v60 = vld [vmem:[%s3811_s3 + $0xf4] ss:$8 sps:$4 sm:$0xff]   ;;  %v2740_v62 = vld [vmem:[%s3813_s5] ss:$8 sps:$4 sm:$0xff]  }
  0xbb   : > { %674 = vmatprep.mubr.bf16.mxu0 %v3001_v1  ;;  %v2739_v61 = vld [vmem:[%s3811_s3 + $0xf0] ss:$8 sps:$4 sm:$0xff]   ;;  %v2742_v63 = vld [vmem:[%s3813_s5 + $0x4] ss:$8 sps:$4 sm:$0xff]   ;;  %v2745_v0 = vld [vmem:[%s3813_s5 + $0x14] ss:$8 sps:$4 sm:$0xff]  }
  0xbc   : > { %984 = vmatpush1.bf16.msra.mxu1 %v2706_v24  ;;  %1247 = vmatprep.subr.bf16.mxu0 %v2742_v63  ;;  %v2743_v2 = vld [vmem:[%s3813_s5 + $0x10] ss:$8 sps:$4 sm:$0xff]   ;;  %v2748_v3 = vld [vmem:[%s3813_s5 + $0x24] ss:$8 sps:$4 sm:$0xff]   ;;  %v2746_v4 = vld [vmem:[%s3813_s5 + $0x20] ss:$8 sps:$4 sm:$0xff]  }
  0xbd   : > { %985 = vmatprep.subr.bf16.mxu1 %v2707_v25  ;;  %1248 = vmatpush1.bf16.msra.mxu0 %v2740_v62  ;;  %v2751_v5 = vld [vmem:[%s3813_s5 + $0x34] ss:$8 sps:$4 sm:$0xff]   ;;  %v2749_v6 = vld [vmem:[%s3813_s5 + $0x30] ss:$8 sps:$4 sm:$0xff]   ;;  %v2754_v7 = vld [vmem:[%s3813_s5 + $0x44] ss:$8 sps:$4 sm:$0xff]  }
  0xbe   : > { %1249 = vmatprep.subr.bf16.mxu0 %v2745_v0  ;;  %v2752_v8 = vld [vmem:[%s3813_s5 + $0x40] ss:$8 sps:$4 sm:$0xff]   ;;  %v2757_v9 = vld [vmem:[%s3813_s5 + $0x54] ss:$8 sps:$4 sm:$0xff]   ;;  %v2755_v10 = vld [vmem:[%s3813_s5 + $0x50] ss:$8 sps:$4 sm:$0xff]  }
  0xbf   : > { %v2760_v11 = vld [vmem:[%s3813_s5 + $0x64] ss:$8 sps:$4 sm:$0xff]   ;;  %v2758_v12 = vld [vmem:[%s3813_s5 + $0x60] ss:$8 sps:$4 sm:$0xff]   ;;  %s528_s18 = sand.u32 1, %s3861_s24   ;;  %vm2247_vm13 = vcmask 786112  }
  0xc0   : > { %986 = vmatpush1.bf16.msra.mxu1 %v2709_v28  ;;  %v565_v16 = vld [vmem:[%s3810_s2] sm:$0x3]  ;;  %vm2254_vm14 = vcmask 851712   ;;  %vm2261_vm15 = vcmask 917312   ;;  %s3862_s23 = sld [smem:[#allocation23_spill]]  ;;  %s529_s4 = scalar_lea.vmem [#allocation12], %s528_s18 }
  0xc1   : > { %987 = vmatprep.subr.bf16.mxu1 %v2710_v29  ;;  %1250 = vmatpush1.bf16.msra.mxu0 %v2743_v2  ;;  %v3460_v18 = vrot.slane %v565_v16, %v569_v15  ;;  %v3462_v19 = vrot.slane %v565_v16, %v573_v17  ;;  %s2292_s25 = sshll.u32 %s529_s4, 4  ;;  %s3863_s20 = sld [smem:[#allocation27_spill]]  ;;  %s3768_s25 = int_to_ptr.vmem [resolvable:$true] %s2292_s25 }
  0xc2   : > { %2419 = vmatmul.mubr.msk.bf16.gmra.mrb[8].mxu0 %vm597_vm0, %v555_v23  ;;  %1251 = vmatprep.subr.bf16.mxu0 %v2748_v3  ;;  %s2280_s28 = scalar_lea.sflag [#allocation5], %s528_s18  ;;  %s2916_s30 = scalar_lea.vmem %s3768_s25, 16 }
  0xc3   : > { %684 = vmatprep.mubr.bf16.mxu0 %v3001_v1  ;;  %p2917_p2 = scmp.ne.s32.totalorder %s3768_s25, %s2916_s30 }
  0xc4   : > { %988 = vmatpush1.bf16.msra.mxu1 %v2712_v30 }
  0xc5   : > { %989 = vmatprep.subr.bf16.mxu1 %v2713_v32  ;;  %1252 = vmatpush1.bf16.msra.mxu0 %v2746_v4 }
  0xc6   : > { %1253 = vmatprep.subr.bf16.mxu0 %v2751_v5  ;;  %p3864_p3 = scmp.ne.s32.totalorder %s3862_s23, 0 }
  0xc7   : > { %s3766_s27 = scalar_lea.hbm %s3863_s20, %s3270_s26 }
  0xc8   : > { %990 = vmatpush1.bf16.msra.mxu1 %v2715_v35  ;;  %p2918_p4 = pnand %p2917_p2, %p3864_p3 }
  0xc9   : > { %991 = vmatprep.subr.bf16.mxu1 %v2716_v36  ;;  %1254 = vmatpush1.bf16.msra.mxu0 %v2749_v6 }
  0xca   : > { %2420 = vmatmul.mubr.msk.bf16.gmra.mrb[12].mxu0 %vm597_vm0, %v556_v31  ;;  %1255 = vmatprep.subr.bf16.mxu0 %v2754_v7  ;;  %p2919_p7 = pneg %p2918_p4 }
  0xcb   : > { %694 = vmatprep.mubr.bf16.mxu0 %v3001_v1 }
  0xcc   : > { %992 = vmatpush1.bf16.msra.mxu1 %v2718_v37 }
  0xcd   : > { %993 = vmatprep.subr.bf16.mxu1 %v2719_v39  ;;  %1256 = vmatpush1.bf16.msra.mxu0 %v2752_v8 }
  0xce   : > { %1257 = vmatprep.subr.bf16.mxu0 %v2757_v9 }
  0xd0   : > { %994 = vmatpush1.bf16.msra.mxu1 %v2721_v42 }
  0xd1   : > { %995 = vmatprep.subr.bf16.mxu1 %v2722_v43  ;;  %1258 = vmatpush1.bf16.msra.mxu0 %v2755_v10 }
  0xd2   : > { %2421 = vmatmul.mubr.msk.bf16.gmra.mrb[16].mxu0 %vm597_vm0, %v557_v38  ;;  %1259 = vmatprep.subr.bf16.mxu0 %v2760_v11 }
  0xd3   : > { %704 = vmatprep.mubr.bf16.mxu0 %v3001_v1 }
  0xd4   : > { %996 = vmatpush1.bf16.msra.mxu1 %v2724_v45 }
  0xd5   : > { %997 = vmatprep.subr.bf16.mxu1 %v2725_v46  ;;  %1260 = vmatpush1.bf16.msra.mxu0 %v2758_v12 }
  0xd8   : > { %998 = vmatpush1.bf16.msra.mxu1 %v2727_v49 }
  0xd9   : > { %999 = vmatprep.subr.bf16.mxu1 %v2728_v50 }
  0xda   : > { %2422 = vmatmul.mubr.msk.bf16.gmra.mrb[20].mxu0 %vm597_vm0, %v558_v44 }
  0xdb   : > { %714 = vmatprep.mubr.bf16.mxu0 %v3001_v1 }
  0xdc   : > { %1000 = vmatpush1.bf16.msra.mxu1 %v2730_v52 }
  0xdd   : > { %1001 = vmatprep.subr.bf16.mxu1 %v2731_v53 }
  0xe0   : > { %1002 = vmatpush1.bf16.msra.mxu1 %v2733_v57 }
  0xe1   : > { %1003 = vmatprep.subr.bf16.mxu1 %v2734_v58 }
  0xe2   : > { %2423 = vmatmul.mubr.msk.bf16.gmra.mrb[24].mxu0 %vm597_vm0, %v559_v51 }
  0xe3   : > { %724 = vmatprep.mubr.bf16.mxu0 %v3001_v1 }
  0xe4   : > { %1004 = vmatpush1.bf16.msra.mxu1 %v2736_v59 }
  0xe5   : > { %1005 = vmatprep.subr.bf16.mxu1 %v2737_v60 }
  0xe8   : > { %1006 = vmatpush1.bf16.msra.mxu1 %v2739_v61 }
  0xea   : > { %2424 = vmatmul.mubr.msk.bf16.gmra.mrb[28].mxu0 %vm597_vm0, %v560_v56  ;;  %vm2268_vm0 = vcmask 982912  }
  0xeb   : > { %1279 = vmatprep.mubr.bf16.mxu0 %v3001_v1 }
 0x185   : > { %v656_v20 = vpop.f32.mrb[0].mxu0 }
 0x186   : > { %v657_v21 = vadd.f32 %v656_v20, %v3460_v18  ;;  %v658_v22 = vpop.f32.mrb[1].mxu0 }
 0x187   : > { %v659_v23 = vadd.f32 %v658_v22, %v3462_v19  ;;  %v660_v24 = vpop.f32.mrb[2].mxu0 }
 0x188   : > { %v661_v25 = vadd.f32 %v660_v24, %v3460_v18  ;;  %v662_v26 = vpop.f32.mrb[3].mxu0  ;;  %v735_v28 = vmax.f32 %v657_v21, 0.0 }
 0x189   : > { %v663_v27 = vadd.f32 %v662_v26, %v3462_v19  ;;  %v736_v30 = vmax.f32 %v659_v23, 0.0 }
 0x18a   : > { %v737_v29 = vmax.f32 %v661_v25, 0.0 }
 0x18b   : > { %v738_v31 = vmax.f32 %v663_v27, 0.0 }
 0x18c   : > { %v767_v32 = vpack.c.bf16 %v737_v29, %v735_v28 }
 0x18d   : > { %v666_v33 = vpop.f32.mrb[4].mxu0  ;;  %v768_v34 = vpack.c.bf16 %v738_v31, %v736_v30 }
 0x18e   : > { %v667_v35 = vadd.f32 %v666_v33, %v3460_v18  ;;  %v668_v36 = vpop.f32.mrb[5].mxu0 }
 0x18f   : > { %v669_v37 = vadd.f32 %v668_v36, %v3462_v19  ;;  %v670_v38 = vpop.f32.mrb[6].mxu0  ;;  %1007 = vmatprep.mubr.bf16.mxu1 %v768_v34 }
 0x190   : > { %v671_v39 = vadd.f32 %v670_v38, %v3460_v18  ;;  %v672_v40 = vpop.f32.mrb[7].mxu0  ;;  %1008 = vmatmul.mubr.bf16.vlgmr.msra.gmra.mrb[0].mxu1 %v767_v32  ;;  %v739_v42 = vmax.f32 %v667_v35, 0.0 }
 0x191   : > { %v673_v41 = vadd.f32 %v672_v40, %v3462_v19  ;;  %v740_v44 = vmax.f32 %v669_v37, 0.0 }
 0x192   : > { %v741_v43 = vmax.f32 %v671_v39, 0.0 }
 0x193   : > { %v742_v45 = vmax.f32 %v673_v41, 0.0 }
 0x194   : > { %v769_v46 = vpack.c.bf16 %v741_v43, %v739_v42 }
 0x195   : > { %v770_v47 = vpack.c.bf16 %v742_v45, %v740_v44  ;;  %v676_v48 = vpop.f32.mrb[8].mxu0 }
 0x196   : > { %v677_v49 = vadd.f32 %v676_v48, %v3460_v18  ;;  %v678_v50 = vpop.f32.mrb[9].mxu0 }
 0x197   : > { %v679_v51 = vadd.f32 %v678_v50, %v3462_v19  ;;  %v680_v52 = vpop.f32.mrb[10].mxu0  ;;  %1017 = vmatprep.mubr.bf16.mxu1 %v770_v47 }
 0x198   : > { %v681_v53 = vadd.f32 %v680_v52, %v3460_v18  ;;  %v682_v54 = vpop.f32.mrb[11].mxu0  ;;  %1018 = vmatmul.mubr.bf16.gmra.mrb[4].mxu1 %v769_v46  ;;  %v743_v56 = vmax.f32 %v677_v49, 0.0 }
 0x199   : > { %v683_v55 = vadd.f32 %v682_v54, %v3462_v19  ;;  %v744_v58 = vmax.f32 %v679_v51, 0.0 }
 0x19a   : > { %v745_v57 = vmax.f32 %v681_v53, 0.0 }
 0x19b   : > { %v746_v59 = vmax.f32 %v683_v55, 0.0 }
 0x19c   : > { %v771_v60 = vpack.c.bf16 %v745_v57, %v743_v56 }
 0x19d   : > { %v772_v61 = vpack.c.bf16 %v746_v59, %v744_v58  ;;  %v686_v62 = vpop.f32.mrb[12].mxu0 }
 0x19e   : > { %v687_v63 = vadd.f32 %v686_v62, %v3460_v18  ;;  %v688_v0 = vpop.f32.mrb[13].mxu0 }
 0x19f   : > { %v689_v2 = vadd.f32 %v688_v0, %v3462_v19  ;;  %v690_v3 = vpop.f32.mrb[14].mxu0  ;;  %1027 = vmatprep.mubr.bf16.mxu1 %v772_v61 }
 0x1a0   : > { %v691_v4 = vadd.f32 %v690_v3, %v3460_v18  ;;  %v692_v5 = vpop.f32.mrb[15].mxu0  ;;  %1028 = vmatmul.mubr.bf16.gmra.mrb[8].mxu1 %v771_v60  ;;  %v747_v7 = vmax.f32 %v687_v63, 0.0 }
 0x1a1   : > { %v693_v6 = vadd.f32 %v692_v5, %v3462_v19  ;;  %v748_v9 = vmax.f32 %v689_v2, 0.0 }
 0x1a2   : > { %v749_v8 = vmax.f32 %v691_v4, 0.0 }
 0x1a3   : > { %v750_v10 = vmax.f32 %v693_v6, 0.0 }
 0x1a4   : > { %v773_v11 = vpack.c.bf16 %v749_v8, %v747_v7 }
 0x1a5   : > { %v774_v12 = vpack.c.bf16 %v750_v10, %v748_v9  ;;  %v696_v15 = vpop.f32.mrb[16].mxu0  ;;  %v2761_v10 = vld [vmem:[%s3813_s5 + $0x70] ss:$8 sps:$4 sm:$0xff]  }
 0x1a6   : > { %v697_v16 = vadd.f32 %v696_v15, %v3460_v18  ;;  %v698_v17 = vpop.f32.mrb[17].mxu0  ;;  %v2767_v15 = vld [vmem:[#allocation11 + $0x18] sm:$0xff]  }
 0x1a7   : > { %v699_v20 = vadd.f32 %v698_v17, %v3462_v19  ;;  %v700_v21 = vpop.f32.mrb[18].mxu0  ;;  %1037 = vmatprep.mubr.bf16.mxu1 %v774_v12  ;;  %v2766_v12 = vld [vmem:[#allocation11 + $0x10] sm:$0xff]  }
 0x1a8   : > { %v701_v22 = vadd.f32 %v700_v21, %v3460_v18  ;;  %v702_v23 = vpop.f32.mrb[19].mxu0  ;;  %1038 = vmatmul.mubr.bf16.gmra.mrb[12].mxu1 %v773_v11  ;;  %v751_v25 = vmax.f32 %v697_v16, 0.0  ;;  %v2764_v11 = vld [vmem:[#allocation11] sm:$0xff]   ;;  %v3502_v16 = vld [vmem:[#allocation6] ss:$0 sm:$0xff] }
 0x1a9   : > { %v703_v24 = vadd.f32 %v702_v23, %v3462_v19  ;;  %v752_v27 = vmax.f32 %v699_v20, 0.0  ;;  %2531 = vmatprep.subr.bf16.mxu1 %v2764_v11 }
 0x1aa   : > { %v753_v26 = vmax.f32 %v701_v22, 0.0  ;;  %2532 = vmatpush3.bf16.msra.mxu1 %v2764_v11 }
 0x1ab   : > { %v754_v28 = vmax.f32 %v703_v24, 0.0 }
 0x1ac   : > { %v775_v29 = vpack.c.bf16 %v753_v26, %v751_v25 }
 0x1ad   : > { %v776_v30 = vpack.c.bf16 %v754_v28, %v752_v27  ;;  %v706_v31 = vpop.f32.mrb[20].mxu0 }
 0x1ae   : > { %v707_v32 = vadd.f32 %v706_v31, %v3460_v18  ;;  %v708_v33 = vpop.f32.mrb[21].mxu0 }
 0x1af   : > { %v709_v34 = vadd.f32 %v708_v33, %v3462_v19  ;;  %v710_v35 = vpop.f32.mrb[22].mxu0  ;;  %1047 = vmatprep.mubr.bf16.mxu1 %v776_v30 }
 0x1b0   : > { %v711_v36 = vadd.f32 %v710_v35, %v3460_v18  ;;  %v712_v37 = vpop.f32.mrb[23].mxu0  ;;  %1048 = vmatmul.mubr.bf16.gmra.mrb[16].mxu1 %v775_v29  ;;  %v755_v39 = vmax.f32 %v707_v32, 0.0 }
 0x1b1   : > { %v713_v38 = vadd.f32 %v712_v37, %v3462_v19  ;;  %v756_v41 = vmax.f32 %v709_v34, 0.0 }
 0x1b2   : > { %v757_v40 = vmax.f32 %v711_v36, 0.0 }
 0x1b3   : > { %v758_v42 = vmax.f32 %v713_v38, 0.0 }
 0x1b4   : > { %v777_v43 = vpack.c.bf16 %v757_v40, %v755_v39 }
 0x1b5   : > { %v778_v44 = vpack.c.bf16 %v758_v42, %v756_v41  ;;  %v716_v45 = vpop.f32.mrb[24].mxu0 }
 0x1b6   : > { %v717_v46 = vadd.f32 %v716_v45, %v3460_v18  ;;  %v718_v47 = vpop.f32.mrb[25].mxu0 }
 0x1b7   : > { %v719_v48 = vadd.f32 %v718_v47, %v3462_v19  ;;  %v720_v49 = vpop.f32.mrb[26].mxu0  ;;  %1057 = vmatprep.mubr.bf16.mxu1 %v778_v44 }
 0x1b8   : > { %v721_v50 = vadd.f32 %v720_v49, %v3460_v18  ;;  %v722_v51 = vpop.f32.mrb[27].mxu0  ;;  %1058 = vmatmul.mubr.bf16.gmra.mrb[20].mxu1 %v777_v43  ;;  %v759_v53 = vmax.f32 %v717_v46, 0.0 }
 0x1b9   : > { %v723_v52 = vadd.f32 %v722_v51, %v3462_v19  ;;  %v760_v55 = vmax.f32 %v719_v48, 0.0 }
 0x1ba   : > { %v761_v54 = vmax.f32 %v721_v50, 0.0 }
 0x1bb   : > { %v762_v56 = vmax.f32 %v723_v52, 0.0 }
 0x1bc   : > { %v779_v57 = vpack.c.bf16 %v761_v54, %v759_v53 }
 0x1bd   : > { %v780_v58 = vpack.c.bf16 %v762_v56, %v760_v55  ;;  %v726_v59 = vpop.f32.mrb[28].mxu0 }
 0x1be   : > { %v727_v60 = vadd.f32 %v726_v59, %v3460_v18  ;;  %v728_v61 = vpop.f32.mrb[29].mxu0 }
 0x1bf   : > { %v729_v62 = vadd.f32 %v728_v61, %v3462_v19  ;;  %v730_v63 = vpop.f32.mrb[30].mxu0  ;;  %1067 = vmatprep.mubr.bf16.mxu1 %v780_v58 }
 0x1c0   : > { %v731_v0 = vadd.f32 %v730_v63, %v3460_v18  ;;  %v732_v2 = vpop.f32.mrb[31].mxu0  ;;  %1068 = vmatmul.mubr.bf16.gmra.mrb[24].mxu1 %v779_v57  ;;  %v763_v4 = vmax.f32 %v727_v60, 0.0  ;;  %v2763_v18 = vld [vmem:[%s3813_s5 + $0x74] ss:$8 sps:$4 sm:$0xff]  }
 0x1c1   : > { %v733_v3 = vadd.f32 %v732_v2, %v3462_v19  ;;  %v764_v6 = vmax.f32 %v729_v62, 0.0  ;;  %1261 = vmatprep.subr.bf16.mxu0 %v2763_v18  ;;  %v2765_v19 = vld [vmem:[#allocation11 + $0x8] sm:$0xff]  }
 0x1c2   : > { %v765_v5 = vmax.f32 %v731_v0, 0.0  ;;  %1262 = vmatpush1.bf16.msra.mxu0 %v2761_v10  ;;  %2533 = vmatprep.subr.bf16.mxu1 %v2765_v19 }
 0x1c3   : > { %v766_v7 = vmax.f32 %v733_v3, 0.0  ;;  %2534 = vmatpush3.bf16.msra.mxu1 %v2765_v19 }
 0x1c4   : > { %v781_v8 = vpack.c.bf16 %v765_v5, %v763_v4  ;;  %2535 = vmatprep.subr.bf16.mxu1 %v2766_v12 }
 0x1c5   : > { %v782_v9 = vpack.c.bf16 %v766_v7, %v764_v6 }
 0x1c7   : > { %1077 = vmatprep.mubr.bf16.mxu1 %v782_v9  ;;  %2536 = vmatpush3.bf16.msra.mxu1 %v2766_v12 }
 0x1c8   : > { %1078 = vmatmul.mubr.bf16.gmra.mrb[28].mxu1 %v781_v8  ;;  %2537 = vmatprep.subr.bf16.mxu1 %v2767_v15 }
 0x1cb   : > { %2538 = vmatpush3.bf16.msra.mxu1 %v2767_v15 }
 0x263   : > { %v1009_v17 = vpop.f32.mrb[0].mxu1 }
 0x264   : > { %v1095_v20 = vadd.f32 %v3502_v16, %v1009_v17  ;;  %v1011_v21 = vpop.f32.mrb[1].mxu1 }
 0x265   : > { %v1013_v22 = vpop.f32.mrb[2].mxu1 }
 0x266   : > { %v1111_v23 = vmax.f32 %v1095_v20, 0.0  ;;  %v1096_v24 = vadd.f32 %v3502_v16, %v1013_v22  ;;  %v1015_v25 = vpop.f32.mrb[3].mxu1 }
 0x268   : > { %v1127_v26 = vadd.f32 %v1111_v23, %v1011_v21  ;;  %v1112_v27 = vmax.f32 %v1096_v24, 0.0 }
 0x26a   : > { %v1128_v28 = vadd.f32 %v1112_v27, %v1015_v25 }
 0x26b   : > { %v1019_v29 = vpop.f32.mrb[4].mxu1 }
 0x26c   : > { %v1143_v30 = vpack.c.bf16 %v1128_v28, %v1127_v26  ;;  %v1097_v31 = vadd.f32 %v3502_v16, %v1019_v29  ;;  %v1021_v32 = vpop.f32.mrb[5].mxu1 }
 0x26d   : > { %v1023_v33 = vpop.f32.mrb[6].mxu1 }
 0x26e   : > { %v1113_v34 = vmax.f32 %v1097_v31, 0.0  ;;  %v1098_v35 = vadd.f32 %v3502_v16, %v1023_v33  ;;  %v1025_v36 = vpop.f32.mrb[7].mxu1  ;;  %1280 = vmatmul.mubr.bf16.vlgmr.msra.gmra.mrb[32].mxu0 %v1143_v30 }
 0x26f   : > { %1289 = vmatprep.mubr.bf16.mxu0 %v3001_v1 }
 0x270   : > { %v1129_v37 = vadd.f32 %v1113_v34, %v1021_v32  ;;  %v1114_v38 = vmax.f32 %v1098_v35, 0.0 }
 0x272   : > { %v1130_v39 = vadd.f32 %v1114_v38, %v1025_v36 }
 0x273   : > { %v1029_v40 = vpop.f32.mrb[8].mxu1 }
 0x274   : > { %v1144_v41 = vpack.c.bf16 %v1130_v39, %v1129_v37  ;;  %v1099_v42 = vadd.f32 %v3502_v16, %v1029_v40  ;;  %v1031_v43 = vpop.f32.mrb[9].mxu1 }
 0x275   : > { %v1033_v44 = vpop.f32.mrb[10].mxu1 }
 0x276   : > { %v1115_v45 = vmax.f32 %v1099_v42, 0.0  ;;  %v1100_v46 = vadd.f32 %v3502_v16, %v1033_v44  ;;  %v1035_v47 = vpop.f32.mrb[11].mxu1  ;;  %1290 = vmatmul.mubr.bf16.gmra.mrb[36].mxu0 %v1144_v41 }
 0x277   : > { %1299 = vmatprep.mubr.bf16.mxu0 %v3001_v1 }
 0x278   : > { %v1131_v48 = vadd.f32 %v1115_v45, %v1031_v43  ;;  %v1116_v49 = vmax.f32 %v1100_v46, 0.0 }
 0x27a   : > { %v1132_v50 = vadd.f32 %v1116_v49, %v1035_v47  ;;  %v2768_v47 = vld [vmem:[#allocation11 + $0x20] sm:$0xff]   ;;  %v2770_v49 = vld [vmem:[#allocation11 + $0x30] sm:$0xff]  }
 0x27b   : > { %v1039_v51 = vpop.f32.mrb[12].mxu1  ;;  %2539 = vmatprep.subr.bf16.mxu1 %v2768_v47 }
 0x27c   : > { %v1145_v52 = vpack.c.bf16 %v1132_v50, %v1131_v48  ;;  %v1101_v53 = vadd.f32 %v3502_v16, %v1039_v51  ;;  %v1041_v54 = vpop.f32.mrb[13].mxu1  ;;  %2540 = vmatpush3.bf16.msra.mxu1 %v2768_v47  ;;  %v2769_v48 = vld [vmem:[#allocation11 + $0x28] sm:$0xff]   ;;  %v2771_v50 = vld [vmem:[#allocation11 + $0x38] sm:$0xff]  }
 0x27d   : > { %v1043_v55 = vpop.f32.mrb[14].mxu1  ;;  %2541 = vmatprep.subr.bf16.mxu1 %v2769_v48 }
 0x27e   : > { %v1117_v56 = vmax.f32 %v1101_v53, 0.0  ;;  %v1102_v57 = vadd.f32 %v3502_v16, %v1043_v55  ;;  %v1045_v58 = vpop.f32.mrb[15].mxu1  ;;  %1300 = vmatmul.mubr.bf16.gmra.mrb[40].mxu0 %v1145_v52 }
 0x27f   : > { %1309 = vmatprep.mubr.bf16.mxu0 %v3001_v1 }
 0x280   : > { %v1133_v59 = vadd.f32 %v1117_v56, %v1041_v54  ;;  %v1118_v60 = vmax.f32 %v1102_v57, 0.0  ;;  %2542 = vmatpush3.bf16.msra.mxu1 %v2769_v48 }
 0x281   : > { %2543 = vmatprep.subr.bf16.mxu1 %v2770_v49 }
 0x282   : > { %v1134_v61 = vadd.f32 %v1118_v60, %v1045_v58 }
 0x283   : > { %v1049_v62 = vpop.f32.mrb[16].mxu1 }
 0x284   : > { %v1146_v63 = vpack.c.bf16 %v1134_v61, %v1133_v59  ;;  %v1103_v0 = vadd.f32 %v3502_v16, %v1049_v62  ;;  %v1051_v2 = vpop.f32.mrb[17].mxu1  ;;  %2544 = vmatpush3.bf16.msra.mxu1 %v2770_v49  ;;  %v3531_v59 = vld [vmem:[#allocation9] ss:$0 sm:$0xff] }
 0x285   : > { %v1053_v3 = vpop.f32.mrb[18].mxu1  ;;  %2545 = vmatprep.subr.bf16.mxu1 %v2771_v50 }
 0x286   : > { %v1119_v4 = vmax.f32 %v1103_v0, 0.0  ;;  %v1104_v5 = vadd.f32 %v3502_v16, %v1053_v3  ;;  %v1055_v6 = vpop.f32.mrb[19].mxu1  ;;  %1310 = vmatmul.mubr.bf16.gmra.mrb[44].mxu0 %v1146_v63 }
 0x287   : > { %1319 = vmatprep.mubr.bf16.mxu0 %v3001_v1 }
 0x288   : > { %v1135_v7 = vadd.f32 %v1119_v4, %v1051_v2  ;;  %v1120_v8 = vmax.f32 %v1104_v5, 0.0  ;;  %2546 = vmatpush3.bf16.msra.mxu1 %v2771_v50 }
 0x28a   : > { %v1136_v9 = vadd.f32 %v1120_v8, %v1055_v6 }
 0x28b   : > { %v1059_v10 = vpop.f32.mrb[20].mxu1 }
 0x28c   : > { %v1147_v18 = vpack.c.bf16 %v1136_v9, %v1135_v7  ;;  %v1105_v11 = vadd.f32 %v3502_v16, %v1059_v10  ;;  %v1061_v19 = vpop.f32.mrb[21].mxu1 }
 0x28d   : > { %v1063_v12 = vpop.f32.mrb[22].mxu1 }
 0x28e   : > { %v1121_v15 = vmax.f32 %v1105_v11, 0.0  ;;  %v1106_v17 = vadd.f32 %v3502_v16, %v1063_v12  ;;  %v1065_v20 = vpop.f32.mrb[23].mxu1  ;;  %1320 = vmatmul.mubr.bf16.gmra.mrb[48].mxu0 %v1147_v18 }
 0x28f   : > { %1329 = vmatprep.mubr.bf16.mxu0 %v3001_v1 }
 0x290   : > { %v1137_v21 = vadd.f32 %v1121_v15, %v1061_v19  ;;  %v1122_v22 = vmax.f32 %v1106_v17, 0.0 }
 0x292   : > { %v1138_v23 = vadd.f32 %v1122_v22, %v1065_v20 }
 0x293   : > { %v1069_v24 = vpop.f32.mrb[24].mxu1 }
 0x294   : > { %v1148_v25 = vpack.c.bf16 %v1138_v23, %v1137_v21  ;;  %v1107_v26 = vadd.f32 %v3502_v16, %v1069_v24  ;;  %v1071_v27 = vpop.f32.mrb[25].mxu1 }
 0x295   : > { %v1073_v28 = vpop.f32.mrb[26].mxu1 }
 0x296   : > { %v1123_v29 = vmax.f32 %v1107_v26, 0.0  ;;  %v1108_v30 = vadd.f32 %v3502_v16, %v1073_v28  ;;  %v1075_v31 = vpop.f32.mrb[27].mxu1  ;;  %1330 = vmatmul.mubr.bf16.gmra.mrb[52].mxu0 %v1148_v25 }
 0x297   : > { %1339 = vmatprep.mubr.bf16.mxu0 %v3001_v1 }
 0x298   : > { %v1139_v32 = vadd.f32 %v1123_v29, %v1071_v27  ;;  %v1124_v33 = vmax.f32 %v1108_v30, 0.0 }
 0x29a   : > { %v1140_v34 = vadd.f32 %v1124_v33, %v1075_v31 }
 0x29b   : > { %v1079_v35 = vpop.f32.mrb[28].mxu1 }
 0x29c   : > { %v1149_v36 = vpack.c.bf16 %v1140_v34, %v1139_v32  ;;  %v1109_v37 = vadd.f32 %v3502_v16, %v1079_v35  ;;  %v1081_v38 = vpop.f32.mrb[29].mxu1 }
 0x29d   : > { %v1083_v39 = vpop.f32.mrb[30].mxu1 }
 0x29e   : > { %v1125_v40 = vmax.f32 %v1109_v37, 0.0  ;;  %v1110_v41 = vadd.f32 %v3502_v16, %v1083_v39  ;;  %v1085_v42 = vpop.f32.mrb[31].mxu1  ;;  %1340 = vmatmul.mubr.bf16.gmra.mrb[56].mxu0 %v1149_v36  ;;  %v3527_v16 = vld [vmem:[#allocation8] ss:$0 sm:$0xff] }
 0x29f   : > { %1349 = vmatprep.mubr.bf16.mxu0 %v3001_v1 }
 0x2a0   : > { %v1141_v43 = vadd.f32 %v1125_v40, %v1081_v38  ;;  %v1126_v44 = vmax.f32 %v1110_v41, 0.0 }
 0x2a2   : > { %v1142_v45 = vadd.f32 %v1126_v44, %v1085_v42 }
 0x2a4   : > { %v1150_v46 = vpack.c.bf16 %v1142_v45, %v1141_v43 }
 0x2a6   : > { %1350 = vmatmul.mubr.bf16.gmra.mrb[60].mxu0 %v1150_v46 }
 0x341   : > { %v1281_v1 = vpop.f32.mrb[32].mxu0 }
 0x342   : > { %v1367_v51 = vadd.f32 %v3527_v16, %v1281_v1  ;;  %v1283_v52 = vpop.f32.mrb[33].mxu0 }
 0x343   : > { %v1285_v53 = vpop.f32.mrb[34].mxu0 }
 0x344   : > { %v1383_v54 = vmax.f32 %v1367_v51, 0.0  ;;  %v1368_v55 = vadd.f32 %v3527_v16, %v1285_v53  ;;  %v1287_v56 = vpop.f32.mrb[35].mxu0 }
 0x346   : > { %v1399_v57 = vadd.f32 %v1383_v54, %v1283_v52  ;;  %v1384_v58 = vmax.f32 %v1368_v55, 0.0 }
 0x348   : > { %v1400_v60 = vadd.f32 %v1384_v58, %v1287_v56  ;;  %v1422_v62 = vadd.f32 %v3531_v59, %v1399_v57 }
 0x349   : > { %v1291_v61 = vpop.f32.mrb[36].mxu0 }
 0x34a   : > { %v1423_v63 = vadd.f32 %v3531_v59, %v1400_v60  ;;  %v1369_v0 = vadd.f32 %v3527_v16, %v1291_v61  ;;  %v1293_v2 = vpop.f32.mrb[37].mxu0 }
 0x34b   : > { %v1295_v3 = vpop.f32.mrb[38].mxu0 }
 0x34c   : > { %v1385_v4 = vmax.f32 %v1369_v0, 0.0  ;;  %v1370_v5 = vadd.f32 %v3527_v16, %v1295_v3  ;;  %v1297_v6 = vpop.f32.mrb[39].mxu0  ;;  %v1438_v7 = vpack.c.bf16 %v1423_v63, %v1422_v62 }
 0x34e   : > { %v1401_v8 = vadd.f32 %v1385_v4, %v1293_v2  ;;  %v1386_v9 = vmax.f32 %v1370_v5, 0.0  ;;  %2547 = vmatprep.mubr.bf16.mxu1 %v1438_v7 }
 0x350   : > { %v1402_v10 = vadd.f32 %v1386_v9, %v1297_v6  ;;  %v1424_v11 = vadd.f32 %v3531_v59, %v1401_v8 }
 0x351   : > { %v1301_v18 = vpop.f32.mrb[40].mxu0 }
 0x352   : > { %v1425_v19 = vadd.f32 %v3531_v59, %v1402_v10  ;;  %v1371_v12 = vadd.f32 %v3527_v16, %v1301_v18  ;;  %v1303_v15 = vpop.f32.mrb[41].mxu0 }
 0x353   : > { %v1305_v17 = vpop.f32.mrb[42].mxu0 }
 0x354   : > { %v1439_v20 = vpack.c.bf16 %v1425_v19, %v1424_v11  ;;  %v1387_v21 = vmax.f32 %v1371_v12, 0.0  ;;  %v1372_v22 = vadd.f32 %v3527_v16, %v1305_v17  ;;  %v1307_v23 = vpop.f32.mrb[43].mxu0 }
 0x356   : > { %v1403_v24 = vadd.f32 %v1387_v21, %v1303_v15  ;;  %v1388_v25 = vmax.f32 %v1372_v22, 0.0  ;;  %2548 = vmatmul.mubr.bf16.vlgmr.msra.gmra.mrb[32].mxu1 %v1439_v20 }
 0x358   : > { %v1404_v26 = vadd.f32 %v1388_v25, %v1307_v23  ;;  %v1426_v28 = vadd.f32 %v3531_v59, %v1403_v24 }
 0x359   : > { %v1311_v27 = vpop.f32.mrb[44].mxu0 }
 0x35a   : > { %v1427_v29 = vadd.f32 %v3531_v59, %v1404_v26  ;;  %v1373_v30 = vadd.f32 %v3527_v16, %v1311_v27  ;;  %v1313_v31 = vpop.f32.mrb[45].mxu0 }
 0x35b   : > { %v1315_v32 = vpop.f32.mrb[46].mxu0 }
 0x35c   : > { %v1389_v33 = vmax.f32 %v1373_v30, 0.0  ;;  %v1374_v34 = vadd.f32 %v3527_v16, %v1315_v32  ;;  %v1317_v35 = vpop.f32.mrb[47].mxu0  ;;  %v1440_v36 = vpack.c.bf16 %v1427_v29, %v1426_v28 }
 0x35e   : > { %v1405_v37 = vadd.f32 %v1389_v33, %v1313_v31  ;;  %v1390_v38 = vmax.f32 %v1374_v34, 0.0  ;;  %2551 = vmatprep.mubr.bf16.mxu1 %v1440_v36  ;;  %v2774_v36 = vld [vmem:[%s3818_s10 + $0x10] sm:$0xff]  }
 0x360   : > { %v1406_v39 = vadd.f32 %v1390_v38, %v1317_v35  ;;  %v1428_v41 = vadd.f32 %v3531_v59, %v1405_v37  ;;  %v2772_v35 = vld [vmem:[%s3818_s10] sm:$0xff]  }
 0x361   : > { %v1321_v40 = vpop.f32.mrb[48].mxu0  ;;  %2563 = vmatprep.subr.bf16.mxu0 %v2772_v35 }
 0x362   : > { %v1429_v42 = vadd.f32 %v3531_v59, %v1406_v39  ;;  %v1375_v43 = vadd.f32 %v3527_v16, %v1321_v40  ;;  %v1323_v44 = vpop.f32.mrb[49].mxu0  ;;  %2564 = vmatpush3.bf16.msra.mxu0 %v2772_v35 }
 0x363   : > { %v1325_v45 = vpop.f32.mrb[50].mxu0 }
 0x364   : > { %v1391_v46 = vmax.f32 %v1375_v43, 0.0  ;;  %v1376_v47 = vadd.f32 %v3527_v16, %v1325_v45  ;;  %v1327_v48 = vpop.f32.mrb[51].mxu0  ;;  %v1441_v49 = vpack.c.bf16 %v1429_v42, %v1428_v41 }
 0x366   : > { %v1407_v50 = vadd.f32 %v1391_v46, %v1323_v44  ;;  %v1392_v1 = vmax.f32 %v1376_v47, 0.0  ;;  %2552 = vmatmul.mubr.bf16.gmra.mrb[36].mxu1 %v1441_v49 }
 0x368   : > { %v1408_v51 = vadd.f32 %v1392_v1, %v1327_v48  ;;  %v1430_v53 = vadd.f32 %v3531_v59, %v1407_v50 }
 0x369   : > { %v1331_v52 = vpop.f32.mrb[52].mxu0 }
 0x36a   : > { %v1431_v54 = vadd.f32 %v3531_v59, %v1408_v51  ;;  %v1377_v55 = vadd.f32 %v3527_v16, %v1331_v52  ;;  %v1333_v56 = vpop.f32.mrb[53].mxu0  ;;  %v3606_v52 = vld [vmem:[%s3817_s9] ss:$0 sm:$0xff] }
 0x36b   : > { %v1335_v57 = vpop.f32.mrb[54].mxu0 }
 0x36c   : > { %v1393_v58 = vmax.f32 %v1377_v55, 0.0  ;;  %v1378_v60 = vadd.f32 %v3527_v16, %v1335_v57  ;;  %v1337_v61 = vpop.f32.mrb[55].mxu0  ;;  %v1442_v62 = vpack.c.bf16 %v1431_v54, %v1430_v53 }
 0x36e   : > { %v1409_v63 = vadd.f32 %v1393_v58, %v1333_v56  ;;  %v1394_v0 = vmax.f32 %v1378_v60, 0.0  ;;  %2555 = vmatprep.mubr.bf16.mxu1 %v1442_v62 }
 0x370   : > { %v1410_v2 = vadd.f32 %v1394_v0, %v1337_v61  ;;  %v1432_v4 = vadd.f32 %v3531_v59, %v1409_v63 }
 0x371   : > { %v1341_v3 = vpop.f32.mrb[56].mxu0 }
 0x372   : > { %v1433_v5 = vadd.f32 %v3531_v59, %v1410_v2  ;;  %v1379_v6 = vadd.f32 %v3527_v16, %v1341_v3  ;;  %v1343_v7 = vpop.f32.mrb[57].mxu0 }
 0x373   : > { %v1345_v8 = vpop.f32.mrb[58].mxu0 }
 0x374   : > { %v1395_v9 = vmax.f32 %v1379_v6, 0.0  ;;  %v1380_v10 = vadd.f32 %v3527_v16, %v1345_v8  ;;  %v1347_v18 = vpop.f32.mrb[59].mxu0  ;;  %v1443_v11 = vpack.c.bf16 %v1433_v5, %v1432_v4 }
 0x376   : > { %v1411_v19 = vadd.f32 %v1395_v9, %v1343_v7  ;;  %v1396_v12 = vmax.f32 %v1380_v10, 0.0  ;;  %2556 = vmatmul.mubr.bf16.gmra.mrb[40].mxu1 %v1443_v11 }
 0x378   : > { %v1412_v15 = vadd.f32 %v1396_v12, %v1347_v18  ;;  %v1434_v20 = vadd.f32 %v3531_v59, %v1411_v19 }
 0x379   : > { %v1351_v17 = vpop.f32.mrb[60].mxu0 }
 0x37a   : > { %v1435_v21 = vadd.f32 %v3531_v59, %v1412_v15  ;;  %v1381_v22 = vadd.f32 %v3527_v16, %v1351_v17  ;;  %v1353_v23 = vpop.f32.mrb[61].mxu0 }
 0x37b   : > { %v1355_v24 = vpop.f32.mrb[62].mxu0 }
 0x37c   : > { %v1397_v25 = vmax.f32 %v1381_v22, 0.0  ;;  %v1382_v26 = vadd.f32 %v3527_v16, %v1355_v24  ;;  %v1357_v27 = vpop.f32.mrb[63].mxu0  ;;  %v1444_v28 = vpack.c.bf16 %v1435_v21, %v1434_v20  ;;  %v2773_v16 = vld [vmem:[%s3818_s10 + $0x8] sm:$0xff]  }
 0x37d   : > { %2565 = vmatprep.subr.bf16.mxu0 %v2773_v16 }
 0x37e   : > { %v1413_v29 = vadd.f32 %v1397_v25, %v1353_v23  ;;  %v1398_v30 = vmax.f32 %v1382_v26, 0.0  ;;  %2559 = vmatprep.mubr.bf16.mxu1 %v1444_v28  ;;  %2566 = vmatpush3.bf16.msra.mxu0 %v2773_v16 }
 0x37f   : > { %2567 = vmatprep.subr.bf16.mxu0 %v2774_v36 }
 0x380   : > { %v1414_v31 = vadd.f32 %v1398_v30, %v1357_v27  ;;  %v1436_v32 = vadd.f32 %v3531_v59, %v1413_v29 }
 0x382   : > { %v1437_v33 = vadd.f32 %v3531_v59, %v1414_v31  ;;  %2568 = vmatpush3.bf16.msra.mxu0 %v2774_v36  ;;  %v2775_v59 = vld [vmem:[%s3818_s10 + $0x18] sm:$0xff]  }
 0x383   : > { %2569 = vmatprep.subr.bf16.mxu0 %v2775_v59 }
 0x384   : > { %v1445_v34 = vpack.c.bf16 %v1437_v33, %v1436_v32 }
 0x386   : > { %2560 = vmatmul.mubr.bf16.gmra.mrb[44].mxu1 %v1445_v34  ;;  %2570 = vmatpush3.bf16.msra.mxu0 %v2775_v59 }
 0x429   : > { %v2549_v37 = vpop.f32.mrb[32].mxu1 }
 0x42a   : > { %1666 = vrot.lane.b32.xlu1 %v2549_v37, %s3002_s22  ;;  %v1544_v38 = vpop.f32.mrb[33].mxu1  ;;  %v1616_v53 = vadd.f32 %v2549_v37, %v3606_v52 }
 0x42b   : > { %1662 = vrot.lane.b32.xlu0 %v1544_v38, %s3002_s22  ;;  %v2550_v39 = vpop.f32.mrb[34].mxu1  ;;  %v1614_v55 = vadd.f32 %v3606_v52, %v1544_v38 }
 0x42c   : > { %v1547_v40 = vpop.f32.mrb[35].mxu1  ;;  %v1617_v54 = vadd.f32 %v2550_v39, %v3606_v52  ;;  %v1632_v60 = vmax.f32 %v1616_v53, 0.0 }
 0x42d   : > { %v1615_v56 = vadd.f32 %v3606_v52, %v1547_v40  ;;  %v1630_v62 = vmax.f32 %v1614_v55, 0.0 }
 0x42e   : > { %1668 = vrot.lane.b32.xlu1 %v2550_v39, %s3002_s22  ;;  %v1633_v61 = vmax.f32 %v1617_v54, 0.0 }
 0x42f   : > { %1664 = vrot.lane.b32.xlu0 %v1547_v40, %s3002_s22  ;;  %v1631_v63 = vmax.f32 %v1615_v56, 0.0 }
 0x439   : > { %v2553_v41 = vpop.f32.mrb[36].mxu1 }
 0x43a   : > { %v1560_v42 = vpop.f32.mrb[37].mxu1  ;;  %v1620_v11 = vadd.f32 %v2553_v41, %v3606_v52 }
 0x43b   : > { %1670 = vrot.lane.b32.xlu0 %v1560_v42, %s3002_s22  ;;  %v2554_v43 = vpop.f32.mrb[38].mxu1  ;;  %v1618_v9 = vadd.f32 %v3606_v52, %v1560_v42 }
 0x43c   : > { %v1563_v44 = vpop.f32.mrb[39].mxu1  ;;  %v1621_v12 = vadd.f32 %v2554_v43, %v3606_v52  ;;  %v1636_v23 = vmax.f32 %v1620_v11, 0.0 }
 0x43d   : > { %1672 = vrot.lane.b32.xlu1 %v1563_v44, %s3002_s22  ;;  %v1619_v10 = vadd.f32 %v3606_v52, %v1563_v44  ;;  %v1634_v19 = vmax.f32 %v1618_v9, 0.0 }
 0x43e   : > { %v1637_v24 = vmax.f32 %v1621_v12, 0.0 }
 0x43f   : > { %1674 = vrot.lane.b32.xlu0 %v2553_v41, %s3002_s22  ;;  %v1635_v15 = vmax.f32 %v1619_v10, 0.0 }
 0x441   : > { %1676 = vrot.lane.b32.xlu1 %v2554_v43, %s3002_s22 }
 0x449   : > { %v2557_v45 = vpop.f32.mrb[40].mxu1 }
 0x44a   : > { %v1576_v46 = vpop.f32.mrb[41].mxu1  ;;  %v1624_v33 = vadd.f32 %v2557_v45, %v3606_v52 }
 0x44b   : > { %1678 = vrot.lane.b32.xlu0 %v1576_v46, %s3002_s22  ;;  %v2558_v47 = vpop.f32.mrb[42].mxu1  ;;  %v1622_v30 = vadd.f32 %v3606_v52, %v1576_v46 }
 0x44c   : > { %v1579_v48 = vpop.f32.mrb[43].mxu1  ;;  %v1625_v35 = vadd.f32 %v2558_v47, %v3606_v52  ;;  %v1640_v39 = vmax.f32 %v1624_v33, 0.0 }
 0x44d   : > { %1680 = vrot.lane.b32.xlu1 %v1579_v48, %s3002_s22  ;;  %v1623_v31 = vadd.f32 %v3606_v52, %v1579_v48  ;;  %v1638_v34 = vmax.f32 %v1622_v30, 0.0 }
 0x44e   : > { %v1641_v40 = vmax.f32 %v1625_v35, 0.0 }
 0x44f   : > { %1682 = vrot.lane.b32.xlu0 %v2557_v45, %s3002_s22  ;;  %v1639_v16 = vmax.f32 %v1623_v31, 0.0 }
 0x451   : > { %1684 = vrot.lane.b32.xlu1 %v2558_v47, %s3002_s22 }
 0x459   : > { %v3587_v49 = vpop.f32.mrb[44].mxu1 }
 0x45a   : > { %v3589_v50 = vpop.f32.mrb[45].mxu1  ;;  %v1628_v53 = vadd.f32 %v3587_v49, %v3606_v52 }
 0x45b   : > { %1686 = vrot.lane.b32.xlu0 %v3589_v50, %s3002_s22  ;;  %v3593_v1 = vpop.f32.mrb[46].mxu1  ;;  %v1626_v45 = vadd.f32 %v3606_v52, %v3589_v50 }
 0x45c   : > { %v3595_v51 = vpop.f32.mrb[47].mxu1  ;;  %v1629_v55 = vadd.f32 %v3593_v1, %v3606_v52 }
 0x45d   : > { %1688 = vrot.lane.b32.xlu1 %v3595_v51, %s3002_s22  ;;  %v1627_v47 = vadd.f32 %v3606_v52, %v3595_v51  ;;  %v1642_v54 = vmax.f32 %v1626_v45, 0.0 }
 0x45f   : > { %1690 = vrot.lane.b32.xlu0 %v3587_v49, %s3002_s22  ;;  %v1643_v56 = vmax.f32 %v1627_v47, 0.0 }
 0x461   : > { %1692 = vrot.lane.b32.xlu1 %v3593_v1, %s3002_s22  ;;  %s3004_s22 = smov [#allocation12]  }
 0x462   : > { %s2920_s19 = sshll.u32 %s3004_s22, 4  ;;  %s2921_s19 = int_to_ptr.vmem [resolvable:$false] %s2920_s19 }
 0x463   : > { %s2922_s29 = scalar_lea.vmem %s2921_s19, 32  ;;  %p2923_p8 = scmp.lt.s32.totalorder %s3768_s25, %s2921_s19 }
 0x464   : > { %p2924_p11 = scmp.lt.s32.totalorder %s2922_s29, %s2916_s30 }
 0x466   : > { %p2925_p13 = por %p2924_p11, %p2923_p8 }
 0x468   : > { %p2926_p1 = pnand %p2925_p13, %p2919_p7 }
 0x49c   : > { %v1667_v57 = vpop.permute.xlu1 %1666 }
 0x49d   : > { %v1663_v58 = vpop.permute.xlu0 %1662  ;;  %v1712_v2 = vadd.f32 %v1667_v57, %v1632_v60 }
 0x49e   : > { %v1710_v5 = vadd.f32 %v1663_v58, %v1630_v62  ;;  %v1644_v62 = vmax.f32 %v1628_v53, 0.0 }
 0x4a0   : > { %v1669_v0 = vpop.permute.xlu1 %1668 }
 0x4a1   : > { %v1713_v3 = vadd.f32 %v1669_v0, %v1633_v61  ;;  %v1665_v4 = vpop.permute.xlu0 %1664 }
 0x4a2   : > { %v1711_v6 = vadd.f32 %v1665_v4, %v1631_v63  ;;  %v1645_v63 = vmax.f32 %v1629_v55, 0.0 }
 0x4a3   : > { %v1727_v7 = vpack.c.bf16 %v1713_v3, %v1712_v2 }
 0x4a4   : > { %v1726_v8 = vpack.c.bf16 %v1711_v6, %v1710_v5 }
 0x4a6   : > { %2571 = vmatprep.mubr.msk.bf16.mxu0 %vm1766_vm1, %v1726_v8 }
 0x4a7   : > { %2572 = vmatmul.mubr.msk.bf16.vlgmr.msra.gmra.mrb[64].mxu0 %vm1766_vm1, %v1727_v7 }
 0x4ad   : > { %v1671_v18 = vpop.permute.xlu0 %1670 }
 0x4ae   : > { %v1714_v20 = vadd.f32 %v1671_v18, %v1634_v19 }
 0x4af   : > { %v1673_v17 = vpop.permute.xlu1 %1672 }
 0x4b0   : > { %v1715_v21 = vadd.f32 %v1673_v17, %v1635_v15 }
 0x4b1   : > { %v1675_v22 = vpop.permute.xlu0 %1674 }
 0x4b2   : > { %v1728_v25 = vpack.c.bf16 %v1715_v21, %v1714_v20  ;;  %v1716_v27 = vadd.f32 %v1675_v22, %v1636_v23  ;;  %v3663_v20 = vld [vmem:[%s3819_s11] ss:$0 sm:$0xff] }
 0x4b3   : > { %v1677_v26 = vpop.permute.xlu1 %1676 }
 0x4b4   : > { %v1717_v28 = vadd.f32 %v1677_v26, %v1637_v24  ;;  %2575 = vmatprep.mubr.msk.bf16.mxu0 %vm1766_vm1, %v1728_v25  ;;  %v3671_v26 = vld [vmem:[%s3820_s12] ss:$0 sm:$0xff] }
 0x4b6   : > { %v1729_v29 = vpack.c.bf16 %v1717_v28, %v1716_v27 }
 0x4b8   : > { %2576 = vmatmul.mubr.msk.bf16.gmra.mrb[68].mxu0 %vm1766_vm1, %v1729_v29 }
 0x4bd   : > { %v1679_v32 = vpop.permute.xlu0 %1678 }
 0x4be   : > { %v1718_v59 = vadd.f32 %v1679_v32, %v1638_v34 }
 0x4bf   : > { %v1681_v36 = vpop.permute.xlu1 %1680 }
 0x4c0   : > { %v1719_v37 = vadd.f32 %v1681_v36, %v1639_v16 }
 0x4c1   : > { %v1683_v38 = vpop.permute.xlu0 %1682 }
 0x4c2   : > { %v1730_v41 = vpack.c.bf16 %v1719_v37, %v1718_v59  ;;  %v1720_v43 = vadd.f32 %v1683_v38, %v1640_v39 }
 0x4c3   : > { %v1685_v42 = vpop.permute.xlu1 %1684 }
 0x4c4   : > { %v1721_v44 = vadd.f32 %v1685_v42, %v1641_v40  ;;  %2579 = vmatprep.mubr.msk.bf16.mxu0 %vm1766_vm1, %v1730_v41 }
 0x4c6   : > { %v1731_v46 = vpack.c.bf16 %v1721_v44, %v1720_v43 }
 0x4c8   : > { %2580 = vmatmul.mubr.msk.bf16.gmra.mrb[72].mxu0 %vm1766_vm1, %v1731_v46 }
 0x4cd   : > { %v1687_v48 = vpop.permute.xlu0 %1686 }
 0x4ce   : > { %v1722_v58 = vadd.f32 %v1687_v48, %v1642_v54 }
 0x4cf   : > { %v1689_v57 = vpop.permute.xlu1 %1688 }
 0x4d0   : > { %v1723_v60 = vadd.f32 %v1689_v57, %v1643_v56 }
 0x4d1   : > { %v1691_v61 = vpop.permute.xlu0 %1690 }
 0x4d2   : > { %v1732_v0 = vpack.c.bf16 %v1723_v60, %v1722_v58  ;;  %v1724_v2 = vadd.f32 %v1691_v61, %v1644_v62 }
 0x4d3   : > { %v1693_v50 = vpop.permute.xlu1 %1692 }
 0x4d4   : > { %v1725_v3 = vadd.f32 %v1693_v50, %v1645_v63  ;;  %2583 = vmatprep.mubr.msk.bf16.mxu0 %vm1766_vm1, %v1732_v0 }
 0x4d6   : > { %v1733_v51 = vpack.c.bf16 %v1725_v3, %v1724_v2 }
 0x4d8   : > { %2584 = vmatmul.mubr.msk.bf16.gmra.mrb[76].mxu0 %vm1766_vm1, %v1733_v51  ;;  %vm2275_vm1 = vcmask 1048512  }
 0x57a   : > { %v2573_v49 = vpop.f32.mrb[64].mxu0 }
 0x57b   : > { %v1825_v4 = vpop.f32.mrb[65].mxu0  ;;  %1947 = vrot.lane.b32.xlu0 %v2573_v49, %s3003_s17  ;;  %v1897_v21 = vadd.f32 %v2573_v49, %v3663_v20 }
 0x57c   : > { %v2574_v1 = vpop.f32.mrb[66].mxu0  ;;  %v1895_v23 = vadd.f32 %v3663_v20, %v1825_v4 }
 0x57d   : > { %v1828_v52 = vpop.f32.mrb[67].mxu0  ;;  %1949 = vrot.lane.b32.xlu1 %v2574_v1, %s3003_s17  ;;  %v1913_v22 = vmax.f32 %v1897_v21, 0.0  ;;  %v1898_v24 = vadd.f32 %v2574_v1, %v3663_v20 }
 0x57e   : > { %v1896_v27 = vadd.f32 %v3663_v20, %v1828_v52  ;;  %v1911_v30 = vmax.f32 %v1895_v23, 0.0 }
 0x57f   : > { %1943 = vrot.lane.b32.xlu0 %v1825_v4, %s3003_s17  ;;  %v1914_v31 = vmax.f32 %v1898_v24, 0.0 }
 0x580   : > { %v1912_v34 = vmax.f32 %v1896_v27, 0.0 }
 0x581   : > { %1945 = vrot.lane.b32.xlu1 %v1828_v52, %s3003_s17 }
 0x58b   : > { %v2577_v5 = vpop.f32.mrb[68].mxu0 }
 0x58c   : > { %v1841_v6 = vpop.f32.mrb[69].mxu0  ;;  %1955 = vrot.lane.b32.xlu0 %v2577_v5, %s3003_s17  ;;  %v1901_v43 = vadd.f32 %v2577_v5, %v3663_v20 }
 0x58d   : > { %v2578_v7 = vpop.f32.mrb[70].mxu0  ;;  %v1899_v47 = vadd.f32 %v3663_v20, %v1841_v6 }
 0x58e   : > { %v1844_v8 = vpop.f32.mrb[71].mxu0  ;;  %1957 = vrot.lane.b32.xlu1 %v2578_v7, %s3003_s17  ;;  %v1902_v46 = vadd.f32 %v2578_v7, %v3663_v20  ;;  %v1917_v45 = vmax.f32 %v1901_v43, 0.0 }
 0x58f   : > { %v1900_v54 = vadd.f32 %v3663_v20, %v1844_v8  ;;  %v1915_v57 = vmax.f32 %v1899_v47, 0.0 }
 0x590   : > { %1951 = vrot.lane.b32.xlu0 %v1841_v6, %s3003_s17  ;;  %v1918_v53 = vmax.f32 %v1902_v46, 0.0 }
 0x591   : > { %v1916_v62 = vmax.f32 %v1900_v54, 0.0 }
 0x592   : > { %1953 = vrot.lane.b32.xlu1 %v1844_v8, %s3003_s17 }
 0x59b   : > { %v3636_v9 = vpop.f32.mrb[72].mxu0 }
 0x59c   : > { %v3638_v10 = vpop.f32.mrb[73].mxu0  ;;  %1963 = vrot.lane.b32.xlu0 %v3636_v9, %s3003_s17  ;;  %v1905_v52 = vadd.f32 %v3636_v9, %v3663_v20 }
 0x59d   : > { %v3641_v18 = vpop.f32.mrb[74].mxu0  ;;  %v1903_v8 = vadd.f32 %v3663_v20, %v3638_v10 }
 0x59e   : > { %v3643_v11 = vpop.f32.mrb[75].mxu0  ;;  %1965 = vrot.lane.b32.xlu1 %v3641_v18, %s3003_s17  ;;  %v1906_v6 = vadd.f32 %v3641_v18, %v3663_v20  ;;  %v1921_v7 = vmax.f32 %v1905_v52, 0.0 }
 0x59f   : > { %v1904_v23 = vadd.f32 %v3663_v20, %v3643_v11  ;;  %v1919_v27 = vmax.f32 %v1903_v8, 0.0 }
 0x5a0   : > { %1959 = vrot.lane.b32.xlu0 %v3638_v10, %s3003_s17 }
 0x5a2   : > { %1961 = vrot.lane.b32.xlu1 %v3643_v11, %s3003_s17 }
 0x5ab   : > { %v3648_v19 = vpop.f32.mrb[76].mxu0 }
 0x5ac   : > { %v3650_v12 = vpop.f32.mrb[77].mxu0 }
 0x5ad   : > { %1967 = vrot.lane.b32.xlu0 %v3650_v12, %s3003_s17  ;;  %v3653_v15 = vpop.f32.mrb[78].mxu0 }
 0x5ae   : > { %v3655_v17 = vpop.f32.mrb[79].mxu0 }
 0x5af   : > { %1969 = vrot.lane.b32.xlu1 %v3655_v17, %s3003_s17 }
 0x5b1   : > { %1971 = vrot.lane.b32.xlu0 %v3648_v19, %s3003_s17 }
 0x5b3   : > { %1973 = vrot.lane.b32.xlu1 %v3653_v15, %s3003_s17 }
 0x5ed   : > { %v1948_v25 = vpop.permute.xlu0 %1947 }
 0x5ee   : > { %v1993_v28 = vadd.f32 %v1948_v25, %v1913_v22  ;;  %v1922_v22 = vmax.f32 %v1906_v6, 0.0 }
 0x5ef   : > { %v1950_v29 = vpop.permute.xlu1 %1949 }
 0x5f0   : > { %v2016_v32 = vmul.f32 %v3671_v26, %v1993_v28  ;;  %v1994_v35 = vadd.f32 %v1950_v29, %v1914_v31 }
 0x5f1   : > { %v1944_v33 = vpop.permute.xlu0 %1943 }
 0x5f2   : > { %v1991_v16 = vadd.f32 %v1944_v33, %v1911_v30  ;;  %v2037_v36 = vsel %vm2030_vm2, %v2016_v32, 0.0  ;;  %v2017_v41 = vmul.f32 %v3671_v26, %v1994_v35  ;;  %v1920_v30 = vmax.f32 %v1904_v23, 0.0 }
 0x5f3   : > { %v1946_v59 = vpop.permute.xlu1 %1945  ;;  %2038 = vadd.xlane.f32.xlu0 %v2037_v36 }
 0x5f4   : > { %v1992_v37 = vadd.f32 %v1946_v59, %v1912_v34  ;;  %v2014_v38 = vmul.f32 %v3671_v26, %v1991_v16  ;;  %v2040_v44 = vsel %vm2030_vm2, %v2017_v41, 0.0  ;;  %v1908_v59 = vadd.f32 %v3663_v20, %v3655_v17 }
 0x5f6   : > { %v2031_v39 = vsel %vm2030_vm2, %v2014_v38, 0.0  ;;  %v2015_v40 = vmul.f32 %v3671_v26, %v1992_v37  ;;  %v1909_v37 = vadd.f32 %v3648_v19, %v3663_v20  ;;  %v1907_v38 = vadd.f32 %v3663_v20, %v3650_v12 }
 0x5f7   : > { %2032 = vadd.xlane.f32.xlu0 %v2031_v39  ;;  %v1924_v41 = vmax.f32 %v1908_v59, 0.0  ;;  %v3727_v59 = vand.u32 127, %v567_v13 }
 0x5f8   : > { %v2034_v42 = vsel %vm2030_vm2, %v2015_v40, 0.0  ;;  %v1910_v40 = vadd.f32 %v3653_v15, %v3663_v20  ;;  %v1925_v43 = vmax.f32 %v1909_v37, 0.0 }
 0x5f9   : > { %2035 = vadd.xlane.f32.xlu1 %v2034_v42 }
 0x5fa   : > { %v1926_v47 = vmax.f32 %v1910_v40, 0.0 }
 0x5fb   : > { %2041 = vadd.xlane.f32.xlu0 %v2040_v44  ;;  %v1923_v44 = vmax.f32 %v1907_v38, 0.0  ;;  %v2172_v38 = vadd.s32 4294967288, %v3727_v59 }
 0x5fd   : > { %v2175_v40 = vsub.s32 %v2172_v38, %v3453_v14 }
 0x5fe   : > { %v1956_v48 = vpop.permute.xlu0 %1955 }
 0x5ff   : > { %v1997_v55 = vadd.f32 %v1956_v48, %v1917_v45 }
 0x600   : > { %v1958_v56 = vpop.permute.xlu1 %1957 }
 0x601   : > { %v1998_v58 = vadd.f32 %v1958_v56, %v1918_v53  ;;  %v2020_v60 = vmul.f32 %v3671_v26, %v1997_v55 }
 0x602   : > { %v1952_v61 = vpop.permute.xlu0 %1951 }
 0x603   : > { %v1995_v63 = vadd.f32 %v1952_v61, %v1915_v57  ;;  %v2049_v0 = vsel %vm2030_vm2, %v2020_v60, 0.0  ;;  %v2021_v50 = vmul.f32 %v3671_v26, %v1998_v58  ;;  %v2499_v61 = vld [vmem:[#allocation2] ss:$0 sm:$0xff] }
 0x604   : > { %v1954_v2 = vpop.permute.xlu1 %1953  ;;  %2050 = vadd.xlane.f32.xlu1 %v2049_v0 }
 0x605   : > { %v1996_v3 = vadd.f32 %v1954_v2, %v1916_v62  ;;  %v2052_v51 = vsel %vm2030_vm2, %v2021_v50, 0.0  ;;  %v2018_v49 = vmul.f32 %v3671_v26, %v1995_v63 }
 0x606   : > { %2053 = vadd.xlane.f32.xlu0 %v2052_v51 }
 0x607   : > { %v2043_v4 = vsel %vm2030_vm2, %v2018_v49, 0.0  ;;  %v2019_v1 = vmul.f32 %v3671_v26, %v1996_v3 }
 0x608   : > { %2044 = vadd.xlane.f32.xlu1 %v2043_v4 }
 0x609   : > { %v2046_v5 = vsel %vm2030_vm2, %v2019_v1, 0.0 }
 0x60a   : > { %2047 = vadd.xlane.f32.xlu0 %v2046_v5 }
 0x60e   : > { %v1964_v21 = vpop.permute.xlu0 %1963 }
 0x60f   : > { %v2001_v24 = vadd.f32 %v1964_v21, %v1921_v7 }
 0x610   : > { %v1966_v25 = vpop.permute.xlu1 %1965 }
 0x611   : > { %v2002_v28 = vadd.f32 %v1966_v25, %v1922_v22  ;;  %v2024_v9 = vmul.f32 %v3671_v26, %v2001_v24 }
 0x612   : > { %v1960_v29 = vpop.permute.xlu0 %1959 }
 0x613   : > { %v1999_v31 = vadd.f32 %v1960_v29, %v1919_v27  ;;  %v2061_v18 = vsel %vm2030_vm2, %v2024_v9, 0.0  ;;  %v2025_v32 = vmul.f32 %v3671_v26, %v2002_v28 }
 0x614   : > { %v1962_v33 = vpop.permute.xlu1 %1961  ;;  %2062 = vadd.xlane.f32.xlu1 %v2061_v18 }
 0x615   : > { %v2000_v10 = vadd.f32 %v1962_v33, %v1920_v30  ;;  %v2064_v34 = vsel %vm2030_vm2, %v2025_v32, 0.0  ;;  %v2022_v11 = vmul.f32 %v3671_v26, %v1999_v31 }
 0x616   : > { %2065 = vadd.xlane.f32.xlu0 %v2064_v34 }
 0x617   : > { %v2055_v35 = vsel %vm2030_vm2, %v2022_v11, 0.0  ;;  %v2023_v16 = vmul.f32 %v3671_v26, %v2000_v10 }
 0x618   : > { %2056 = vadd.xlane.f32.xlu1 %v2055_v35 }
 0x619   : > { %v2058_v36 = vsel %vm2030_vm2, %v2023_v16, 0.0 }
 0x61a   : > { %2059 = vadd.xlane.f32.xlu0 %v2058_v36 }
 0x61f   : > { %v1968_v39 = vpop.permute.xlu0 %1967 }
 0x620   : > { %v2003_v48 = vadd.f32 %v1968_v39, %v1923_v44  ;;  %v2179_v39 = vadd.s32 4294967280, %v3727_v59 }
 0x621   : > { %v1970_v42 = vpop.permute.xlu1 %1969 }
 0x622   : > { %v2004_v46 = vadd.f32 %v1970_v42, %v1924_v41  ;;  %v2026_v56 = vmul.f32 %v3671_v26, %v2003_v48  ;;  %v2186_v41 = vadd.s32 4294967272, %v3727_v59  ;;  %v2182_v13 = vsub.s32 %v2179_v39, %v3453_v14 }
 0x623   : > { %v1972_v45 = vpop.permute.xlu0 %1971 }
 0x624   : > { %v2005_v53 = vadd.f32 %v1972_v45, %v1925_v43  ;;  %v2027_v17 = vmul.f32 %v3671_v26, %v2004_v46  ;;  %v2067_v58 = vsel %vm2030_vm2, %v2026_v56, 0.0  ;;  %v2193_v43 = vadd.s32 4294967264, %v3727_v59 }
 0x625   : > { %v1974_v54 = vpop.permute.xlu1 %1973  ;;  %v2170_v46 = vsub.s32 %v3727_v59, %v3453_v14  ;;  %v2200_v45 = vadd.s32 4294967256, %v3727_v59  ;;  %v2189_v48 = vsub.s32 %v2186_v41, %v3453_v14 }
 0x626   : > { %v2006_v19 = vadd.f32 %v1974_v54, %v1926_v47  ;;  %v2070_v55 = vsel %vm2030_vm2, %v2027_v17, 0.0  ;;  %v2028_v12 = vmul.f32 %v3671_v26, %v2005_v53  ;;  %v2196_v53 = vsub.s32 %v2193_v43, %v3453_v14 }
 0x627   : > { %2071 = vadd.xlane.f32.xlu0 %v2070_v55 }
 0x628   : > { %v2073_v15 = vsel %vm2030_vm2, %v2028_v12, 0.0  ;;  %v2029_v20 = vmul.f32 %v3671_v26, %v2006_v19  ;;  %v2203_v19 = vsub.s32 %v2200_v45, %v3453_v14  ;;  %v2207_v12 = vadd.s32 4294967248, %v3727_v59 }
 0x629   : > { %2074 = vadd.xlane.f32.xlu1 %v2073_v15 }
 0x62a   : > { %v2076_v57 = vsel %vm2030_vm2, %v2029_v20, 0.0 }
 0x62b   : > { %2077 = vadd.xlane.f32.xlu0 %v2076_v57  ;;  %v2221_v57 = vadd.s32 4294967232, %v3727_v59 }
 0x62d   : > { %2068 = vadd.xlane.f32.xlu1 %v2067_v58 }
 0x680   : > { %v2039_v60 = vpop.xlane.xlu0 %2038 }
 0x681   : > { %v2088_v2 = vadd.f32 %v2499_v61, %v2039_v60  ;;  %v2214_v60 = vadd.s32 4294967240, %v3727_v59 }
 0x684   : > { %v2033_v62 = vpop.xlane.xlu0 %2032 }
 0x685   : > { %v2086_v63 = vadd.f32 %v2499_v61, %v2033_v62  ;;  %v2228_v62 = vadd.s32 4294967224, %v3727_v59 }
 0x686   : > { %v2036_v0 = vpop.xlane.xlu1 %2035 }
 0x687   : > { %v2087_v50 = vadd.f32 %v2499_v61, %v2036_v0  ;;  %2119 = vperm.xlu1 %2684, %v2086_v63   ;;  %v2210_v0 = vsub.s32 %v2207_v12, %v3453_v14 }
 0x688   : > { %v2042_v3 = vpop.xlane.xlu0 %2041 }
 0x689   : > { %2122 = vperm.xlu0 %2685, %v2087_v50   ;;  %v2089_v51 = vadd.f32 %v2499_v61, %v2042_v3  ;;  %v2224_v3 = vsub.s32 %v2221_v57, %v3453_v14 }
 0x68b   : > { %2125 = vperm.xlu1 %2684, %v2088_v2  }
 0x68f   : > { %2128 = vperm.xlu1 %2684, %v2089_v51   ;;  %v2217_v51 = vsub.s32 %v2214_v60, %v3453_v14 }
 0x691   : > { %v2051_v26 = vpop.xlane.xlu1 %2050 }
 0x692   : > { %v2092_v49 = vadd.f32 %v2499_v61, %v2051_v26 }
 0x693   : > { %v2054_v4 = vpop.xlane.xlu0 %2053 }
 0x694   : > { %2137 = vperm.xlu1 %2684, %v2092_v49   ;;  %v2093_v5 = vadd.f32 %v2499_v61, %v2054_v4  ;;  %v2231_v49 = vsub.s32 %v2228_v62, %v3453_v14 }
 0x695   : > { %v2045_v1 = vpop.xlane.xlu1 %2044 }
 0x696   : > { %v2090_v52 = vadd.f32 %v2499_v61, %v2045_v1  ;;  %v2235_v1 = vadd.s32 4294967216, %v3727_v59 }
 0x697   : > { %v2048_v6 = vpop.xlane.xlu0 %2047 }
 0x698   : > { %2131 = vperm.xlu1 %2684, %v2090_v52   ;;  %v2091_v7 = vadd.f32 %v2499_v61, %v2048_v6 }
 0x69c   : > { %2140 = vperm.xlu1 %2684, %v2093_v5  }
 0x6a0   : > { %2134 = vperm.xlu1 %2684, %v2091_v7  }
 0x6a1   : > { %v2063_v8 = vpop.xlane.xlu1 %2062 }
 0x6a2   : > { %v2096_v21 = vadd.f32 %v2499_v61, %v2063_v8  ;;  %v2242_v8 = vadd.s32 4294967208, %v3727_v59 }
 0x6a3   : > { %v2066_v22 = vpop.xlane.xlu0 %2065 }
 0x6a4   : > { %2149 = vperm.xlu0 %2685, %v2096_v21   ;;  %v2097_v25 = vadd.f32 %v2499_v61, %v2066_v22  ;;  %v2238_v22 = vsub.s32 %v2235_v1, %v3453_v14 }
 0x6a5   : > { %v2057_v23 = vpop.xlane.xlu1 %2056 }
 0x6a6   : > { %v2094_v24 = vadd.f32 %v2499_v61, %v2057_v23  ;;  %v2249_v23 = vadd.s32 4294967200, %v3727_v59 }
 0x6a7   : > { %v2060_v27 = vpop.xlane.xlu0 %2059 }
 0x6a8   : > { %2143 = vperm.xlu1 %2684, %v2094_v24   ;;  %v2095_v28 = vadd.f32 %v2499_v61, %v2060_v27 }
 0x6ac   : > { %2152 = vperm.xlu1 %2684, %v2097_v25  }
 0x6b0   : > { %2146 = vperm.xlu1 %2684, %v2095_v28   ;;  %v2245_v28 = vsub.s32 %v2242_v8, %v3453_v14 }
 0x6b4   : > { %v2072_v9 = vpop.xlane.xlu0 %2071 }
 0x6b5   : > { %v2099_v29 = vadd.f32 %v2499_v61, %v2072_v9 }
 0x6b6   : > { %v2075_v30 = vpop.xlane.xlu1 %2074 }
 0x6b7   : > { %2158 = vperm.xlu1 %2684, %v2099_v29   ;;  %v2100_v10 = vadd.f32 %v2499_v61, %v2075_v30  ;;  %v2256_v29 = vadd.s32 4294967192, %v3727_v59 }
 0x6b8   : > { %v2078_v31 = vpop.xlane.xlu0 %2077 }
 0x6b9   : > { %v2101_v18 = vadd.f32 %v2499_v61, %v2078_v31 }
 0x6ba   : > { %v2069_v32 = vpop.xlane.xlu1 %2068 }
 0x6bb   : > { %v2098_v33 = vadd.f32 %v2499_v61, %v2069_v32  ;;  %2164 = vperm.xlu1 %2684, %v2101_v18   ;;  %v2252_v18 = vsub.s32 %v2249_v23, %v3453_v14  ;;  %v2263_v32 = vadd.s32 4294967184, %v3727_v59 }
 0x6bd   : > { %2155 = vperm.xlu0 %2685, %v2098_v33   ;;  %v2270_v33 = vadd.s32 4294967176, %v3727_v59 }
 0x6c1   : > { %2161 = vperm.xlu0 %2685, %v2100_v10  }
 0x706   : > { %v2120_v34 = vpop.permute.xlu1 %2119 }
 0x707   : > { %v2171_v54 = vrot.slane %v2120_v34, %v2170_v46 }
 0x708   : > { %v2123_v42 = vpop.permute.xlu0 %2122 }
 0x709   : > { %v2176_v47 = vrot.slane %v2123_v42, %v2175_v40 }
 0x70a   : > { %v2126_v11 = vpop.permute.xlu1 %2125 }
 0x70b   : > { %v2183_v55 = vrot.slane %v2126_v11, %v2182_v13  ;;  %v2178_v15 = vsel %vm2177_vm3, %v2176_v47, %v2171_v54  ;;  %v2259_v11 = vsub.s32 %v2256_v29, %v3453_v14 }
 0x70d   : > { %v2185_v63 = vsel %vm2184_vm4, %v2183_v55, %v2178_v15 }
 0x70e   : > { %v2129_v35 = vpop.permute.xlu1 %2128 }
 0x70f   : > { %v2190_v20 = vrot.slane %v2129_v35, %v2189_v48 }
 0x711   : > { %v2192_v50 = vsel %vm2191_vm5, %v2190_v20, %v2185_v63 }
 0x713   : > { %v2138_v16 = vpop.permute.xlu1 %2137 }
 0x714   : > { %v2211_v4 = vrot.slane %v2138_v16, %v2210_v0 }
 0x717   : > { %v2132_v36 = vpop.permute.xlu1 %2131 }
 0x718   : > { %v2197_v56 = vrot.slane %v2132_v36, %v2196_v53  ;;  %v2266_v36 = vsub.s32 %v2263_v32, %v3453_v14 }
 0x71a   : > { %v2199_v2 = vsel %vm2198_vm6, %v2197_v56, %v2192_v50 }
 0x71b   : > { %v2141_v37 = vpop.permute.xlu1 %2140 }
 0x71c   : > { %v2218_v7 = vrot.slane %v2141_v37, %v2217_v51  ;;  %v2273_v37 = vsub.s32 %v2270_v33, %v3453_v14 }
 0x71f   : > { %v2135_v44 = vpop.permute.xlu1 %2134 }
 0x720   : > { %v2204_v61 = vrot.slane %v2135_v44, %v2203_v19 }
 0x722   : > { %v2206_v26 = vsel %vm2205_vm7, %v2204_v61, %v2199_v2 }
 0x723   : > { %v2213_v5 = vsel %vm2212_vm8, %v2211_v4, %v2206_v26  ;;  %v2150_v24 = vpop.permute.xlu0 %2149 }
 0x724   : > { %v2220_v25 = vsel %vm2219_vm9, %v2218_v7, %v2213_v5  ;;  %v2239_v30 = vrot.slane %v2150_v24, %v2238_v22 }
 0x727   : > { %v2144_v17 = vpop.permute.xlu1 %2143 }
 0x728   : > { %v2225_v6 = vrot.slane %v2144_v17, %v2224_v3 }
 0x72a   : > { %v2227_v27 = vsel %vm2226_vm10, %v2225_v6, %v2220_v25 }
 0x72b   : > { %v2153_v58 = vpop.permute.xlu1 %2152 }
 0x72c   : > { %v2246_v34 = vrot.slane %v2153_v58, %v2245_v28 }
 0x72f   : > { %v2147_v52 = vpop.permute.xlu1 %2146 }
 0x730   : > { %v2232_v21 = vrot.slane %v2147_v52, %v2231_v49 }
 0x732   : > { %v2234_v9 = vsel %vm2233_vm11, %v2232_v21, %v2227_v27 }
 0x733   : > { %v2241_v10 = vsel %vm2240_vm12, %v2239_v30, %v2234_v9 }
 0x734   : > { %v2248_v38 = vsel %vm2247_vm13, %v2246_v34, %v2241_v10 }
 0x736   : > { %v2159_v31 = vpop.permute.xlu1 %2158 }
 0x737   : > { %v2260_v41 = vrot.slane %v2159_v31, %v2259_v11 }
 0x73a   : > { %v2165_v39 = vpop.permute.xlu1 %2164 }
 0x73b   : > { %v2274_v43 = vrot.slane %v2165_v39, %v2273_v37 }
 0x73c   : > { %v2156_v35 = vpop.permute.xlu0 %2155 }
 0x73d   : > { %v2253_v16 = vrot.slane %v2156_v35, %v2252_v18 }
 0x73f   : > { %v2255_v40 = vsel %vm2254_vm14, %v2253_v16, %v2248_v38 }
 0x740   : > { %v2162_v59 = vpop.permute.xlu0 %2161  ;;  %v2262_v44 = vsel %vm2261_vm15, %v2260_v41, %v2255_v40 }
 0x741   : > { %v2267_v42 = vrot.slane %v2162_v59, %v2266_v36 }
 0x743   : > { %v2269_v46 = vsel %vm2268_vm0, %v2267_v42, %v2262_v44 }
 0x744   : > { %v2276_v14 = vsel %vm2275_vm1, %v2274_v43, %v2269_v46 }
 0x745   : > { %2278 = vst [vmem:[%s529_s4] sm:$0x1] %v2276_v14 }
 0x746   : > { %2929 = shalt.err (!%p2926_p1)
}
 0x747   : > { %s2930_s26 = scalar_lea.hbm %s3766_s27, 16  ;;  %s2934_s13 = scalar_lea.hbm %s3863_s20, 32 }
 0x748   : > { %p2931_p0 = scmp.ne.s32.totalorder %s3766_s27, %s2930_s26  ;;  %p2935_p9 = scmp.lt.u32.totalorder %s3766_s27, %s3863_s20 }
 0x749   : > { %p2936_p12 = scmp.lt.u32.totalorder %s2934_s13, %s2930_s26  ;;  %p2938_p2 = scmp.lt.u32.totalorder %s2930_s26, %s3766_s27 }
 0x74a   : > { %p2932_p6 = pnand %p2931_p0, %p3864_p3 }
 0x74b   : > { %p2937_p10 = por %p2936_p12, %p2935_p9 }
 0x74c   : > { %p2933_p5 = pneg %p2932_p6 }
 0x74d   : > { %p2939_p4 = por %p2938_p2, %p2937_p10 }
 0x74f   : > { %p2940_p7 = pnand %p2939_p4, %p2933_p5 }
 0x751   : > { %2943 = shalt.err (!%p2940_p7)
}
 0x752   : > { %2607 = dma.vmem_to_hbm [thread:$0]  (%p3864_p3), %s3768_s25, 16, %s3766_s27, %s2280_s28  }
 0x753 PF: > { %s3865_s24 = sld [smem:[#allocation20_spill]]  ;;  %s3866_s18 = sld [smem:[#allocation17_spill]] }
 0x754   : > { %s3867_s4 = sld [smem:[#allocation24_spill]] }
 0x759   : > { %p2639_p8 = scmp.ge.s32.totalorder %s3865_s24, 2  ;;  %s2304_s15 = sand.u32 1, %s3866_s18  }
 0x75a   : > { %p3868_p11 = scmp.ne.s32.totalorder %s3867_s4, 0  ;;  %s2305_s21 = scalar_lea.sflag [#allocation5], %s2304_s15 }
 0x75c   : > { %p2626_p13 = pnand %p2639_p8, %p3868_p11 }
 0x75e   : > { %2973 = dma.done.wait (!%p2626_p13), %s2305_s21, 16  }
 0x75f   : > { %2975 = vsyncadd (!%p2626_p13), %s2305_s21, 4294967280  ;;  %s3869_s18 = sld [smem:[#allocation21_spill]]  ;;  %s3870_s15 = sld [smem:[#allocation18_spill]] }
 0x760   : > { %s3871_s16 = sld [smem:[#allocation19_spill]]  ;;  %s3872_s17 = sld [smem:[#allocation22_spill]] }
 0x765   : > { %p29_p1 = scmp.ge.s32.totalorder %s3869_s18, 4  }
 0x767   :  { %31 = sbr.rel (!%p29_p1) target bundleno = 10 (0xa), region = 132 }
 0x76e   :  { %2309 = vsyncpa [#allocation4], 1 }
 0x76f   :  { %2311 = vsyncpa [#allocation4 + $0x1], 1 }
 0x770   :  { %2312 = vsyncpa [#allocation7], 1 }
 0x771   :  { %2313 = vsyncpa [#allocation10], 1 }
 0x772   :  { %2314 = vsyncpa [#allocation5], 1 }
 0x773   :  { %2316 = vsyncpa [#allocation5 + $0x1], 1 }

</bundles_post_ra>
